<compile_context>
chip_gen: v5e
topology: v5e:2x2
jax: 0.10.0
libtpu: 0.0.40
codegen_flags: <defaults>
</compile_context>

<pallas_src>
import numpy as np
import jax
import jax.numpy as jnp
from jax.experimental import pallas as pl
from jax.experimental.pallas import tpu as pltpu

H, W = 21, 15                      # input spatial size implied by the module
KS = (1, 2, 3, 4, 5, 6)            # conv kernel heights
CHS = tuple(25 * k for k in KS)    # output channels per branch: 25..150
TOTAL_C = sum(CHS)                 # 525 real channels
C_PAD = 640                        # 525 padded to 5 full 128-lane tiles
NUM_POS = 24                       # 21 real conv positions, padded to a multiple of 8
POS_CHUNK = 8                      # positions processed per running-max chunk
PATCH = 6 * W                      # 90 = im2col patch size for the largest kernel
PATCH_PAD = 128                    # patch padded to one full lane tile
X_ROWS = NUM_POS + 6 - 1           # 29 zero-padded input rows used by the im2col


def _round_up(v, m):
    return ((v + m - 1) // m) * m


def cnn_kernel(x_ref, w_ref, b_ref, m_ref, out_ref):
    # x_ref:   (tile_n, 24, 128) f32  lane-aligned im2col patches (rows >=90 are zero)
    # w_ref:   (128, 640)        f32  fused zero-padded weights, resident
    # b_ref:   (1, 640)          f32  fused bias, resident
    # m_ref:   (24, 640)         f32  additive mask (0 valid / -1e30 invalid), resident
    # out_ref: (tile_n, 640)     f32  lane-dense output slab
    tn = x_ref.shape[0]
    w = w_ref[...]

    acc = None
    for c in range(NUM_POS // POS_CHUNK):                            # 3 unrolled chunks
        # (tn, 8, 128) -> (tn*8, 128): full sublane-tile collapse, layout-free
        p = x_ref[:, POS_CHUNK * c: POS_CHUNK * (c + 1), :]
        p2 = p.reshape(tn * POS_CHUNK, PATCH_PAD)
        # one MXU matmul per chunk: M = tn*8, K = 128, N = 640 (all lane/sublane aligned)
        y2 = jnp.dot(p2, w, preferred_element_type=jnp.float32)      # (tn*8, 640)
        y = y2.reshape(tn, POS_CHUNK, C_PAD)                          # layout-free
        m = m_ref[POS_CHUNK * c: POS_CHUNK * (c + 1), :]              # (8, 640)
        cm = jnp.max(y + m[None, :, :], axis=1)                       # (tn, 640)
        acc = cm if acc is None else jnp.maximum(acc, cm)             # running masked max

    # bias after the max (equivalent), tanh, single unmasked lane-dense store
    out_ref[...] = jnp.tanh(acc + b_ref[...])


def _pick_tile_n(n):
    """Per-generation batch tile: 256 on 128 MiB VMEM parts, 128 on 64 MiB (v7x)."""
    tile = 256
    try:
        info = pltpu.get_tpu_info()
        vmem = getattr(info, "vmem_capacity_bytes", None)
        if vmem is not None and vmem <= (64 << 20):
            tile = 128
    except Exception:
        pass
    tile = int(min(tile, _round_up(max(n, 1), 8)))
    # keep >= 2 grid steps when the batch allows (megacore / v7x dual TensorCores)
    if n >= 16 and _round_up(n, tile) // tile < 2:
        tile = _round_up(-(-n // 2), 8)
    return tile


def cnn_forward(x_nchw, weights, biases, *, tile_n=None):
    """x_nchw: (N, 1, 21, 15) f32. weights[i]: (25k, 1, k, 15), biases[i]: (25k,)."""
    n = x_nchw.shape[0]
    x = x_nchw[:, 0, :, :].astype(jnp.float32)                         # (N, 21, 15)
    xp = jnp.pad(x, ((0, 0), (0, X_ROWS - H), (0, 0)))                 # (N, 29, 15)

    # wrapper-side im2col: position h -> rows h..h+5 flattened (dh, w)-major, lane-padded
    patches = jnp.concatenate(
        [xp[:, dh:dh + NUM_POS, :] for dh in range(6)], axis=-1)       # (N, 24, 90)
    patches = jnp.pad(patches, ((0, 0), (0, 0), (0, PATCH_PAD - PATCH)))  # (N, 24, 128)

    # fused zero-padded weight (128, 640) and bias (1, 640)
    w_cols = []
    for k, wgt in zip(KS, weights):
        wf = wgt.reshape(wgt.shape[0], -1).T.astype(jnp.float32)       # (k*15, 25k), (kh,kw)-major
        wf = jnp.pad(wf, ((0, PATCH_PAD - k * W), (0, 0)))             # (128, 25k)
        w_cols.append(wf)
    w_fused = jnp.concatenate(w_cols, axis=1)                          # (128, 525)
    w_fused = jnp.pad(w_fused, ((0, 0), (0, C_PAD - TOTAL_C)))         # (128, 640)
    b_fused = jnp.concatenate(
        [b.astype(jnp.float32) for b in biases]).reshape(1, TOTAL_C)   # (1, 525)
    b_fused = jnp.pad(b_fused, ((0, 0), (0, C_PAD - TOTAL_C)))         # (1, 640)

    # additive validity mask over (position, channel); padded channels stay at 0.0
    mask_np = np.full((NUM_POS, C_PAD), -1e30, dtype=np.float32)
    off = 0
    for k, c in zip(KS, CHS):
        mask_np[:H - k + 1, off:off + c] = 0.0                         # 22-k valid positions
        off += c
    mask_np[:, TOTAL_C:] = 0.0
    mask = jnp.asarray(mask_np)

    # batch tiling
    if tile_n is None:
        tile_n = _pick_tile_n(n)
    tile_n = int(min(tile_n, _round_up(max(n, 1), 8)))
    n_pad = _round_up(n, tile_n)
    if n_pad != n:
        patches = jnp.pad(patches, ((0, n_pad - n), (0, 0), (0, 0)))
    grid = (n_pad // tile_n,)
    vmem_limit = (64 if tile_n >= 192 else 48) * 1024 * 1024

    out = pl.pallas_call(
        cnn_kernel,
        out_shape=jax.ShapeDtypeStruct((n_pad, C_PAD), jnp.float32),
        grid_spec=pltpu.PrefetchScalarGridSpec(
            num_scalar_prefetch=0,
            grid=grid,
            in_specs=[
                pl.BlockSpec((tile_n, NUM_POS, PATCH_PAD), lambda i: (i, 0, 0)),  # patches: tiled
                pl.BlockSpec((PATCH_PAD, C_PAD), lambda i: (0, 0)),               # weight: resident
                pl.BlockSpec((1, C_PAD), lambda i: (0, 0)),                       # bias: resident
                pl.BlockSpec((NUM_POS, C_PAD), lambda i: (0, 0)),                 # mask: resident
            ],
            out_specs=pl.BlockSpec((tile_n, C_PAD), lambda i: (i, 0)),
        ),
        compiler_params=pltpu.CompilerParams(
            dimension_semantics=("parallel",),
            vmem_limit_bytes=vmem_limit,
        ),
    )(patches, w_fused, b_fused, mask)
    return out[:n, :TOTAL_C]


def reference_forward(x_nchw, weights, biases):
    """Pure-JAX reference replicating the PyTorch forward."""
    outs = []
    for w, b in zip(weights, biases):
        y = jax.lax.conv_general_dilated(
            x_nchw, w, window_strides=(1, 1), padding='VALID',
            dimension_numbers=('NCHW', 'OIHW', 'NCHW'))                # (N, 25k, 22-k, 1)
        y = y + b[None, :, None, None]
        y = jnp.max(y, axis=(2, 3))                                    # maxpool over all spatial
        outs.append(y)
    return jnp.tanh(jnp.concatenate(outs, axis=1))


if __name__ == "__main__":
    key = jax.random.PRNGKey(0)
    n = 2
    key, kx = jax.random.split(key)
    x = jax.random.normal(kx, (n, 1, H, W), dtype=jnp.float32)

    weights, biases = [], []
    for k in KS:
        key, kw, kb = jax.random.split(key, 3)
        weights.append(0.1 * jax.random.normal(kw, (25 * k, 1, k, W), dtype=jnp.float32))
        biases.append(0.1 * jax.random.normal(kb, (25 * k,), dtype=jnp.float32))

    out = cnn_forward(x, weights, biases)
    out = jax.block_until_ready(out)

    ref = reference_forward(x, weights, biases)
    assert out.shape == (n, TOTAL_C), out.shape
    np.testing.assert_allclose(np.asarray(out), np.asarray(ref), rtol=1e-4, atol=1e-4)
    print("KERNEL_OK")
</pallas_src>

<mosaic_0001>
module attributes {stable_mosaic.version = 11 : i64} {
  func.func @cnn_kernel(%arg0: i32, %arg1: memref<8x24x128xf32, #tpu.memory_space<vmem>>, %arg2: memref<128x640xf32, #tpu.memory_space<vmem>>, %arg3: memref<1x640xf32, #tpu.memory_space<vmem>>, %arg4: memref<24x640xf32, #tpu.memory_space<vmem>>, %arg5: memref<8x640xf32, #tpu.memory_space<vmem>>) attributes {dimension_semantics = [#tpu.dimension_semantics<parallel>], iteration_bounds = array<i64: 1>, scalar_prefetch = 0 : i64, scratch_operands = 0 : i64, tpu.core_type = #tpu.core_type<tc>, window_params = [{transform_indices = @transform_0, window_bounds = array<i64: 8, 24, 128>}, {pipeline_mode = #tpu.pipeline_mode<synchronous>, transform_indices = @transform_1, window_bounds = array<i64: 128, 640>}, {pipeline_mode = #tpu.pipeline_mode<synchronous>, transform_indices = @transform_2, window_bounds = array<i64: 1, 640>}, {pipeline_mode = #tpu.pipeline_mode<synchronous>, transform_indices = @transform_3, window_bounds = array<i64: 24, 640>}, {transform_indices = @transform_4, window_bounds = array<i64: 8, 640>}]} {
    %c0 = arith.constant 0 : index
    %c0_0 = arith.constant 0 : index
    %0 = vector.load %arg2[%c0, %c0_0] : memref<128x640xf32, #tpu.memory_space<vmem>>, vector<128x640xf32>
    %c0_1 = arith.constant 0 : index
    %c0_2 = arith.constant 0 : index
    %c0_3 = arith.constant 0 : index
    %1 = vector.load %arg1[%c0_1, %c0_2, %c0_3] : memref<8x24x128xf32, #tpu.memory_space<vmem>>, vector<8x8x128xf32>
    %2 = vector.shape_cast %1 : vector<8x8x128xf32> to vector<64x128xf32>
    %cst = arith.constant dense<0.000000e+00> : vector<64x640xf32>
    %3 = tpu.matmul %2, %0, %cst {dimension_numbers = #tpu.dot_dimension_numbers<[1], [0], [0], [1], [0, 0, 1, 1], [], []>} : vector<64x128xf32>, vector<128x640xf32>, vector<64x640xf32> -> vector<64x640xf32>
    %4 = vector.shape_cast %3 : vector<64x640xf32> to vector<8x8x640xf32>
    %c0_4 = arith.constant 0 : index
    %c0_5 = arith.constant 0 : index
    %5 = vector.load %arg4[%c0_4, %c0_5] : memref<24x640xf32, #tpu.memory_space<vmem>>, vector<8x640xf32>
    %6 = vector.shape_cast %5 : vector<8x640xf32> to vector<1x8x640xf32>
    %7 = vector.broadcast %6 : vector<1x8x640xf32> to vector<8x8x640xf32>
    %8 = arith.addf %4, %7 : vector<8x8x640xf32>
    %cst_6 = arith.constant dense<0xFF800000> : vector<8x640xf32>
    %9 = vector.multi_reduction <maximumf>, %8, %cst_6 [1] : vector<8x8x640xf32> to vector<8x640xf32>
    %c0_7 = arith.constant 0 : index
    %c8 = arith.constant 8 : index
    %c0_8 = arith.constant 0 : index
    %10 = vector.load %arg1[%c0_7, %c8, %c0_8] : memref<8x24x128xf32, #tpu.memory_space<vmem>>, vector<8x8x128xf32>
    %11 = vector.shape_cast %10 : vector<8x8x128xf32> to vector<64x128xf32>
    %cst_9 = arith.constant dense<0.000000e+00> : vector<64x640xf32>
    %12 = tpu.matmul %11, %0, %cst_9 {dimension_numbers = #tpu.dot_dimension_numbers<[1], [0], [0], [1], [0, 0, 1, 1], [], []>} : vector<64x128xf32>, vector<128x640xf32>, vector<64x640xf32> -> vector<64x640xf32>
    %13 = vector.shape_cast %12 : vector<64x640xf32> to vector<8x8x640xf32>
    %c8_10 = arith.constant 8 : index
    %c0_11 = arith.constant 0 : index
    %14 = vector.load %arg4[%c8_10, %c0_11] : memref<24x640xf32, #tpu.memory_space<vmem>>, vector<8x640xf32>
    %15 = vector.shape_cast %14 : vector<8x640xf32> to vector<1x8x640xf32>
    %16 = vector.broadcast %15 : vector<1x8x640xf32> to vector<8x8x640xf32>
    %17 = arith.addf %13, %16 : vector<8x8x640xf32>
    %cst_12 = arith.constant dense<0xFF800000> : vector<8x640xf32>
    %18 = vector.multi_reduction <maximumf>, %17, %cst_12 [1] : vector<8x8x640xf32> to vector<8x640xf32>
    %19 = arith.maximumf %9, %18 : vector<8x640xf32>
    %c0_13 = arith.constant 0 : index
    %c16 = arith.constant 16 : index
    %c0_14 = arith.constant 0 : index
    %20 = vector.load %arg1[%c0_13, %c16, %c0_14] : memref<8x24x128xf32, #tpu.memory_space<vmem>>, vector<8x8x128xf32>
    %21 = vector.shape_cast %20 : vector<8x8x128xf32> to vector<64x128xf32>
    %cst_15 = arith.constant dense<0.000000e+00> : vector<64x640xf32>
    %22 = tpu.matmul %21, %0, %cst_15 {dimension_numbers = #tpu.dot_dimension_numbers<[1], [0], [0], [1], [0, 0, 1, 1], [], []>} : vector<64x128xf32>, vector<128x640xf32>, vector<64x640xf32> -> vector<64x640xf32>
    %23 = vector.shape_cast %22 : vector<64x640xf32> to vector<8x8x640xf32>
    %c16_16 = arith.constant 16 : index
    %c0_17 = arith.constant 0 : index
    %24 = vector.load %arg4[%c16_16, %c0_17] : memref<24x640xf32, #tpu.memory_space<vmem>>, vector<8x640xf32>
    %25 = vector.shape_cast %24 : vector<8x640xf32> to vector<1x8x640xf32>
    %26 = vector.broadcast %25 : vector<1x8x640xf32> to vector<8x8x640xf32>
    %27 = arith.addf %23, %26 : vector<8x8x640xf32>
    %cst_18 = arith.constant dense<0xFF800000> : vector<8x640xf32>
    %28 = vector.multi_reduction <maximumf>, %27, %cst_18 [1] : vector<8x8x640xf32> to vector<8x640xf32>
    %29 = arith.maximumf %19, %28 : vector<8x640xf32>
    %c0_19 = arith.constant 0 : index
    %c0_20 = arith.constant 0 : index
    %30 = vector.load %arg3[%c0_19, %c0_20] : memref<1x640xf32, #tpu.memory_space<vmem>>, vector<1x640xf32>
    %31 = vector.broadcast %30 : vector<1x640xf32> to vector<8x640xf32>
    %32 = arith.addf %29, %31 : vector<8x640xf32>
    %33 = math.tanh %32 : vector<8x640xf32>
    %c0_21 = arith.constant 0 : index
    %c0_22 = arith.constant 0 : index
    %34 = vector.load %arg5[%c0_21, %c0_22] : memref<8x640xf32, #tpu.memory_space<vmem>>, vector<8x640xf32>
    tpu.vector_store %arg5[%c0_21, %c0_22], %33 {strides = array<i32>} : memref<8x640xf32, #tpu.memory_space<vmem>>, vector<8x640xf32>,
    return
  }
  func.func @transform_0(%arg0: i32) -> (i32, i32, i32) {
    %c0_i32 = arith.constant 0 : i32
    %c0_i32_0 = arith.constant 0 : i32
    %c0_i32_1 = arith.constant 0 : i32
    return %arg0, %c0_i32, %c0_i32_0 : i32, i32, i32
  }
  func.func @transform_1(%arg0: i32) -> (i32, i32) {
    %c0_i32 = arith.constant 0 : i32
    %c0_i32_0 = arith.constant 0 : i32
    %c0_i32_1 = arith.constant 0 : i32
    return %c0_i32, %c0_i32_0 : i32, i32
  }
  func.func @transform_2(%arg0: i32) -> (i32, i32) {
    %c0_i32 = arith.constant 0 : i32
    %c0_i32_0 = arith.constant 0 : i32
    %c0_i32_1 = arith.constant 0 : i32
    return %c0_i32, %c0_i32_0 : i32, i32
  }
  func.func @transform_3(%arg0: i32) -> (i32, i32) {
    %c0_i32 = arith.constant 0 : i32
    %c0_i32_0 = arith.constant 0 : i32
    %c0_i32_1 = arith.constant 0 : i32
    return %c0_i32, %c0_i32_0 : i32, i32
  }
  func.func @transform_4(%arg0: i32) -> (i32, i32) {
    %c0_i32 = arith.constant 0 : i32
    %c0_i32_0 = arith.constant 0 : i32
    return %arg0, %c0_i32 : i32, i32
  }
}

</mosaic_0001>

<bundles_post_ra>
// kernel: tpu_custom_call.1
= control target key start
LH: loop header
LB: loop body
LE: loop exit
PB: predicated region body
PF: predicated region fallthrough
CT: control target
= control target key end

     0   :  { %9 = vsyncpa [#allocation3], 0  ;;  %s3552_s0 = inlined_call_operand.hbm [shape: f32[8,24,128], index: 0, kind: input, shape index: {}]   ;;  %s3553_s1 = inlined_call_operand.hbm [shape: f32[128,640], index: 1, kind: input, shape index: {}]   ;;  %s3554_s2 = inlined_call_operand.hbm [shape: f32[1,640], index: 2, kind: input, shape index: {}]   ;;  %s3555_s3 = inlined_call_operand.hbm [shape: f32[24,640], index: 3, kind: input, shape index: {}]   ;;  %s3556_s4 = inlined_call_operand.hbm [shape: f32[8,640], index: 4, kind: output, shape index: {}]  }
   0x1   :  { %10 = vsyncpa [#allocation6], 0 }
   0x2   :  { %11 = vsyncpa [#allocation9], 0  ;;  %s30_s17 = sshll.u32 %s3553_s1, 4  ;;  %s31_s17 = int_to_ptr.hbm [resolvable:$true] %s30_s17 }
   0x3   :  { %12 = vsyncpa [#allocation4], 0  ;;  %s2236_s18 = smov [#allocation5]   ;;  %s17_s22 = sshll.u32 %s3552_s0, 4  ;;  %s18_s22 = int_to_ptr.hbm [resolvable:$true] %s17_s22 }
   0x4   :  { %s32_s19 = sshll.u32 %s2236_s18, 4  ;;  %s2237_s23 = smov 640   ;;  %s33_s19 = int_to_ptr.vmem [resolvable:$true] %s32_s19 }
   0x5   :  { %s2238_s24 = smov 40   ;;  %s2239_s25 = smov [#allocation2]  }
   0x6   :  { %38 = dma.hbm_to_vmem [thread:$0]  %s31_s17, 10240, %s33_s19, [#allocation6], %s2237_s23, %s2237_s23, %s2238_s24  }
   0x7   :  { %s19_s26 = sshll.u32 %s2239_s25, 4  ;;  %s2240_s27 = smov 128   ;;  %s20_s26 = int_to_ptr.vmem [resolvable:$true] %s19_s26 }
   0x8   :  { %s2241_s28 = smov 8   ;;  %s44_s30 = sshll.u32 %s3554_s2, 4  ;;  %s45_s30 = int_to_ptr.hbm [resolvable:$true] %s44_s30 }
   0x9   :  { %25 = dma.hbm_to_vmem [thread:$0]  %s18_s22, 3072, %s20_s26, [#allocation3], %s2240_s27, %s2240_s27, %s2241_s28  }
   0xa   :  { %s2242_s5 = smov [#allocation7]   ;;  %s54_s8 = sshll.u32 %s3555_s3, 4  ;;  %s55_s8 = int_to_ptr.hbm [resolvable:$true] %s54_s8 }
   0xb   :  { %s46_s6 = sshll.u32 %s2242_s5, 4  ;;  %s2243_s9 = smov [#allocation8]   ;;  %s47_s6 = int_to_ptr.vmem [resolvable:$true] %s46_s6 }
   0xc   :  { %49 = dma.hbm_to_vmem [thread:$0]  %s45_s30, 80, %s47_s6, [#allocation6]  }
   0xd   :  { %s56_s10 = sshll.u32 %s2243_s9, 4  ;;  %s57_s10 = int_to_ptr.vmem [resolvable:$true] %s56_s10 }
   0xe   :  { %62 = dma.hbm_to_vmem [thread:$0]  %s55_s8, 1920, %s57_s10, [#allocation9], %s2237_s23, %s2237_s23, %s2238_s24  }
   0xf   :  { %2228 = dma.done.wait [#allocation3], 3072  }
  0x10   :  { %2229 = vsyncadd [#allocation3], 4294964224 }
  0x11   :  { %2230 = dma.done.wait [#allocation6], 10320  }
  0x12   :  { %2231 = vsyncadd [#allocation6], 4294956976 }
  0x13   :  { %2232 = dma.done.wait [#allocation9], 1920  }
  0x14   :  { %2233 = vsyncadd [#allocation9], 4294965376  ;;  %v2282_v0 = vld [vmem:[#allocation5 + $0x258] sm:$0xff]  ;;  %v2284_v1 = vld [vmem:[#allocation5 + $0x260] sm:$0xff]  ;;  %vm1866_vm0 = vcmask 1041409   ;;  %vm1869_vm1 = vcmask 1042434  }
  0x15   :  { %3647 = vst [vmem:[#allocation15_spill] sm:$0xff] %v2284_v1  ;;  %v2286_v2 = vld [vmem:[#allocation5 + $0x268] sm:$0xff]  ;;  %167 = vmatpush.msra.mxu0 %v2282_v0  ;;  %1971 = vmatpush.msra.mxu3 %v2282_v0  ;;  %v2290_v3 = vld [vmem:[#allocation5 + $0x230] sm:$0xff]  ;;  %v2292_v4 = vld [vmem:[#allocation5 + $0x238] sm:$0xff]  ;;  %vm1872_vm2 = vcmask 1043459   ;;  %vm1875_vm3 = vcmask 1044484  }
  0x16   :  { %3648 = vst [vmem:[#allocation16_spill] sm:$0xff] %v2292_v4  ;;  %v2294_v5 = vld [vmem:[#allocation5 + $0x240] sm:$0xff]  ;;  %208 = vmatpush.msra.mxu1 %v2284_v1  ;;  %249 = vmatpush.msra.mxu2 %v2286_v2  ;;  %v2298_v6 = vld [vmem:[#allocation5 + $0x208] sm:$0xff]  ;;  %v2302_v7 = vld [vmem:[#allocation5 + $0x210] sm:$0xff]  ;;  %vm1878_vm4 = vcmask 1045509   ;;  %vm1881_vm5 = vcmask 1046534  }
  0x17   :  { %168 = vmatpush.msra.mxu0 %v2290_v3  ;;  %1972 = vmatpush.msra.mxu3 %v2290_v3  ;;  %3649 = vst [vmem:[#allocation17_spill] sm:$0xff] %v2302_v7  ;;  %v2304_v8 = vld [vmem:[#allocation5 + $0x218] sm:$0xff]  ;;  %v2308_v9 = vld [vmem:[#allocation5 + $0x1e0] sm:$0xff]  ;;  %v2312_v10 = vld [vmem:[#allocation5 + $0x1e8] sm:$0xff]  ;;  %vm1884_vm6 = vcmask 1047559   ;;  %s2244_s2 = smov [#allocation10]  }
  0x18   :  { %209 = vmatpush.msra.mxu1 %v2292_v4  ;;  %250 = vmatpush.msra.mxu2 %v2294_v5  ;;  %3650 = vst [vmem:[#allocation18_spill] sm:$0xff] %v2312_v10  ;;  %v2314_v11 = vld [vmem:[#allocation5 + $0x1f0] sm:$0xff]  ;;  %v2318_v12 = vld [vmem:[#allocation5 + $0x1b8] sm:$0xff]  ;;  %v2322_v13 = vld [vmem:[#allocation5 + $0x1c0] sm:$0xff]  ;;  %s1957_s3 = sshll.u32 %s2244_s2, 4  ;;  %s1959_s13 = sshll.u32 %s3556_s4, 4  ;;  %s1958_s3 = int_to_ptr.vmem [resolvable:$true] %s1957_s3  ;;  %s1960_s13 = int_to_ptr.hbm [resolvable:$true] %s1959_s13 }
  0x19   :  { %169 = vmatpush.msra.mxu0 %v2298_v6  ;;  %1973 = vmatpush.msra.mxu3 %v2298_v6  ;;  %3651 = vst [vmem:[#allocation19_spill] sm:$0xff] %v2322_v13  ;;  %v2324_v14 = vld [vmem:[#allocation5 + $0x1c8] sm:$0xff]  ;;  %v2328_v15 = vld [vmem:[#allocation5 + $0x190] sm:$0xff]  ;;  %v2332_v16 = vld [vmem:[#allocation5 + $0x198] sm:$0xff] }
  0x1a   :  { %210 = vmatpush.msra.mxu1 %v2302_v7  ;;  %251 = vmatpush.msra.mxu2 %v2304_v8  ;;  %3652 = vst [vmem:[#allocation20_spill] sm:$0xff] %v2332_v16  ;;  %v2334_v17 = vld [vmem:[#allocation5 + $0x1a0] sm:$0xff]  ;;  %v2338_v18 = vld [vmem:[#allocation5 + $0x168] sm:$0xff]  ;;  %v2342_v19 = vld [vmem:[#allocation5 + $0x170] sm:$0xff] }
  0x1b   :  { %170 = vmatpush.msra.mxu0 %v2308_v9  ;;  %1974 = vmatpush.msra.mxu3 %v2308_v9  ;;  %3653 = vst [vmem:[#allocation21_spill] sm:$0xff] %v2338_v18  ;;  %v2344_v20 = vld [vmem:[#allocation5 + $0x178] sm:$0xff]  ;;  %v2348_v21 = vld [vmem:[#allocation5 + $0x140] sm:$0xff]  ;;  %v2352_v22 = vld [vmem:[#allocation5 + $0x148] sm:$0xff] }
  0x1c   :  { %211 = vmatpush.msra.mxu1 %v2312_v10  ;;  %252 = vmatpush.msra.mxu2 %v2314_v11  ;;  %3654 = vst [vmem:[#allocation22_spill] sm:$0xff] %v2342_v19  ;;  %v2354_v23 = vld [vmem:[#allocation5 + $0x150] sm:$0xff]  ;;  %v2358_v24 = vld [vmem:[#allocation5 + $0x118] sm:$0xff]  ;;  %v2362_v25 = vld [vmem:[#allocation5 + $0x120] sm:$0xff] }
  0x1d   :  { %171 = vmatpush.msra.mxu0 %v2318_v12  ;;  %1975 = vmatpush.msra.mxu3 %v2318_v12  ;;  %3655 = vst [vmem:[#allocation23_spill] sm:$0xff] %v2352_v22  ;;  %v2364_v26 = vld [vmem:[#allocation5 + $0x128] sm:$0xff]  ;;  %v2368_v27 = vld [vmem:[#allocation5 + $0xf0] sm:$0xff]  ;;  %v2372_v28 = vld [vmem:[#allocation5 + $0xf8] sm:$0xff] }
  0x1e   :  { %212 = vmatpush.msra.mxu1 %v2322_v13  ;;  %253 = vmatpush.msra.mxu2 %v2324_v14  ;;  %3656 = vst [vmem:[#allocation24_spill] sm:$0xff] %v2362_v25  ;;  %v2374_v29 = vld [vmem:[#allocation5 + $0x100] sm:$0xff]  ;;  %v2378_v30 = vld [vmem:[#allocation5 + $0xc8] sm:$0xff]  ;;  %v2382_v31 = vld [vmem:[#allocation5 + $0xd0] sm:$0xff] }
  0x1f   :  { %172 = vmatpush.msra.mxu0 %v2328_v15  ;;  %1976 = vmatpush.msra.mxu3 %v2328_v15  ;;  %v2384_v32 = vld [vmem:[#allocation5 + $0xd8] sm:$0xff]  ;;  %v2388_v33 = vld [vmem:[#allocation5 + $0xa0] sm:$0xff]  ;;  %v2392_v34 = vld [vmem:[#allocation5 + $0xa8] sm:$0xff] }
  0x20   :  { %213 = vmatpush.msra.mxu1 %v2332_v16  ;;  %254 = vmatpush.msra.mxu2 %v2334_v17  ;;  %v2394_v35 = vld [vmem:[#allocation5 + $0xb0] sm:$0xff]  ;;  %v2398_v36 = vld [vmem:[#allocation5 + $0x78] sm:$0xff]  ;;  %v2402_v37 = vld [vmem:[#allocation5 + $0x80] sm:$0xff] }
  0x21   :  { %173 = vmatpush.msra.mxu0 %v2338_v18  ;;  %1977 = vmatpush.msra.mxu3 %v2338_v18  ;;  %3657 = vst [vmem:[#allocation25_spill] sm:$0xff] %v2394_v35  ;;  %v2404_v38 = vld [vmem:[#allocation5 + $0x88] sm:$0xff]  ;;  %v2408_v39 = vld [vmem:[#allocation5 + $0x50] sm:$0xff]  ;;  %v2412_v40 = vld [vmem:[#allocation5 + $0x58] sm:$0xff] }
  0x22   :  { %214 = vmatpush.msra.mxu1 %v2342_v19  ;;  %255 = vmatpush.msra.mxu2 %v2344_v20  ;;  %3658 = vst [vmem:[#allocation26_spill] sm:$0xff] %v2404_v38  ;;  %v2414_v41 = vld [vmem:[#allocation5 + $0x60] sm:$0xff]  ;;  %v2418_v42 = vld [vmem:[#allocation5 + $0x28] sm:$0xff]  ;;  %v2422_v43 = vld [vmem:[#allocation5 + $0x30] sm:$0xff] }
  0x23   :  { %174 = vmatpush.msra.mxu0 %v2348_v21  ;;  %1978 = vmatpush.msra.mxu3 %v2348_v21  ;;  %3659 = vst [vmem:[#allocation27_spill] sm:$0xff] %v2414_v41  ;;  %v2424_v44 = vld [vmem:[#allocation5 + $0x38] sm:$0xff]  ;;  %v2428_v45 = vld [vmem:[#allocation5] sm:$0xff]  ;;  %v2432_v46 = vld [vmem:[#allocation5 + $0x8] sm:$0xff] }
  0x24   :  { %215 = vmatpush.msra.mxu1 %v2352_v22  ;;  %256 = vmatpush.msra.mxu2 %v2354_v23  ;;  %3660 = vst [vmem:[#allocation28_spill] sm:$0xff] %v2424_v44  ;;  %v2434_v47 = vld [vmem:[#allocation5 + $0x10] sm:$0xff]  ;;  %v2438_v48 = vld [vmem:[#allocation2] sm:$0xff]  ;;  %v2450_v51 = vld [vmem:[#allocation5 + $0x278] sm:$0xff] }
  0x25   :  { %175 = vmatpush.msra.mxu0 %v2358_v24  ;;  %1979 = vmatpush.msra.mxu3 %v2358_v24  ;;  %3661 = vst [vmem:[#allocation29_spill] sm:$0xff] %v2434_v47  ;;  %v2440_v49 = vld [vmem:[#allocation2 + $0x60] sm:$0xff]  ;;  %v2446_v50 = vld [vmem:[#allocation5 + $0x270] sm:$0xff]  ;;  %v2454_v52 = vld [vmem:[#allocation5 + $0x248] sm:$0xff] }
  0x26   :  { %216 = vmatpush.msra.mxu1 %v2362_v25  ;;  %257 = vmatpush.msra.mxu2 %v2364_v26  ;;  %v2458_v53 = vld [vmem:[#allocation5 + $0x250] sm:$0xff]  ;;  %v2461_v54 = vld [vmem:[#allocation5 + $0x220] sm:$0xff]  ;;  %v2466_v55 = vld [vmem:[#allocation5 + $0x228] sm:$0xff] }
  0x27   :  { %176 = vmatpush.msra.mxu0 %v2368_v27  ;;  %1980 = vmatpush.msra.mxu3 %v2368_v27  ;;  %v2469_v56 = vld [vmem:[#allocation5 + $0x1f8] sm:$0xff]  ;;  %v2475_v58 = vld [vmem:[#allocation5 + $0x200] sm:$0xff]  ;;  %v2484_v60 = vld [vmem:[#allocation5 + $0x1d0] sm:$0xff] }
  0x28   :  { %217 = vmatpush.msra.mxu1 %v2372_v28  ;;  %258 = vmatpush.msra.mxu2 %v2374_v29  ;;  %v2471_v57 = vld [vmem:[#allocation2 + $0x18] sm:$0xff]  ;;  %v2492_v62 = vld [vmem:[#allocation5 + $0x1a8] sm:$0xff]  ;;  %v2494_v63 = vld [vmem:[#allocation5 + $0x1b0] sm:$0xff] }
  0x29   :  { %177 = vmatpush.msra.mxu0 %v2378_v30  ;;  %1981 = vmatpush.msra.mxu3 %v2378_v30  ;;  %v2477_v59 = vld [vmem:[#allocation2 + $0x78] sm:$0xff]  ;;  %3663 = vst [vmem:[#allocation31_spill] sm:$0xff] %v2494_v63 }
  0x2a   :  { %218 = vmatpush.msra.mxu1 %v2382_v31  ;;  %259 = vmatpush.msra.mxu2 %v2384_v32  ;;  %v2486_v61 = vld [vmem:[#allocation5 + $0x1d8] sm:$0xff] }
  0x2b   :  { %178 = vmatpush.msra.mxu0 %v2388_v33  ;;  %1982 = vmatpush.msra.mxu3 %v2388_v33  ;;  %3662 = vst [vmem:[#allocation30_spill] sm:$0xff] %v2486_v61 }
  0x2c   :  { %219 = vmatpush.msra.mxu1 %v2392_v34  ;;  %260 = vmatpush.msra.mxu2 %v2394_v35  ;;  %v2545_v35 = vld [vmem:[#allocation2 + $0x48] sm:$0xff] }
  0x2d   :  { %179 = vmatpush.msra.mxu0 %v2398_v36  ;;  %1983 = vmatpush.msra.mxu3 %v2398_v36 }
  0x2e   :  { %220 = vmatpush.msra.mxu1 %v2402_v37  ;;  %261 = vmatpush.msra.mxu2 %v2404_v38  ;;  %v2524_v38 = vld [vmem:[#allocation5 + $0x138] sm:$0xff] }
  0x2f   :  { %180 = vmatpush.msra.mxu0 %v2408_v39  ;;  %1984 = vmatpush.msra.mxu3 %v2408_v39  ;;  %3666 = vst [vmem:[#allocation34_spill] sm:$0xff] %v2524_v38 }
  0x30   :  { %221 = vmatpush.msra.mxu1 %v2412_v40  ;;  %262 = vmatpush.msra.mxu2 %v2414_v41  ;;  %v2519_v41 = vld [vmem:[#allocation5 + $0x130] sm:$0xff] }
  0x31   :  { %181 = vmatpush.msra.mxu0 %v2418_v42  ;;  %1985 = vmatpush.msra.mxu3 %v2418_v42 }
  0x32   :  { %222 = vmatpush.msra.mxu1 %v2422_v43  ;;  %263 = vmatpush.msra.mxu2 %v2424_v44  ;;  %v2510_v44 = vld [vmem:[#allocation5 + $0x160] sm:$0xff] }
  0x33   :  { %182 = vmatpush.msra.mxu0 %v2428_v45  ;;  %1986 = vmatpush.msra.mxu3 %v2428_v45  ;;  %3665 = vst [vmem:[#allocation33_spill] sm:$0xff] %v2510_v44 }
  0x34   :  { %223 = vmatpush.msra.mxu1 %v2432_v46  ;;  %264 = vmatpush.msra.mxu2 %v2434_v47  ;;  %v2508_v47 = vld [vmem:[#allocation5 + $0x158] sm:$0xff] }
  0x35   :  { %183 = vmatmul.f32.vlgmr.msra.gmra.mxu0 %v2438_v48  ;;  %195 = vmatmul.f32.vlgmr.msra.gmra.mxu3 %v2440_v49 }
  0x36   :  { %224 = vmatmul.f32.vlgmr.msra.gmra.mxu1 %v2438_v48  ;;  %265 = vmatmul.f32.vlgmr.msra.gmra.mxu2 %v2438_v48 }
  0x37   :  { %706 = vmatpush.msrb.mxu2 %v2284_v1  ;;  %290 = vmatpush.msrb.mxu3 %v2446_v50  ;;  %v2506_v1 = vld [vmem:[#allocation2 + $0x30] sm:$0xff] }
  0x38   :  { %331 = vmatpush.msrb.mxu0 %v2450_v51  ;;  %665 = vmatpush.msrb.mxu1 %v2282_v0 }
  0x39   :  { %291 = vmatpush.msrb.mxu3 %v2454_v52  ;;  %707 = vmatpush.msrb.mxu2 %v2292_v4  ;;  %v2501_v4 = vld [vmem:[#allocation5 + $0x188] sm:$0xff] }
  0x3a   :  { %332 = vmatpush.msrb.mxu0 %v2458_v53  ;;  %666 = vmatpush.msrb.mxu1 %v2290_v3  ;;  %3664 = vst [vmem:[#allocation32_spill] sm:$0xff] %v2501_v4 }
  0x3b   :  { %292 = vmatpush.msrb.mxu3 %v2461_v54  ;;  %708 = vmatpush.msrb.mxu2 %v2302_v7  ;;  %v2499_v7 = vld [vmem:[#allocation5 + $0x180] sm:$0xff] }
  0x3c   :  { %333 = vmatpush.msrb.mxu0 %v2466_v55  ;;  %667 = vmatpush.msrb.mxu1 %v2298_v6 }
  0x3d   :  { %293 = vmatpush.msrb.mxu3 %v2469_v56  ;;  %186 = vmatmul.f32.gmra.mxu0 %v2471_v57 }
  0x3e   :  { %334 = vmatpush.msrb.mxu0 %v2475_v58  ;;  %198 = vmatmul.f32.gmra.mxu3 %v2477_v59 }
  0x3f   :  { %227 = vmatmul.f32.gmra.mxu1 %v2471_v57  ;;  %268 = vmatmul.f32.gmra.mxu2 %v2471_v57 }
  0x40   :  { %294 = vmatpush.msrb.mxu3 %v2484_v60  ;;  %335 = vmatpush.msrb.mxu0 %v2486_v61  ;;  %v2551_v61 = vld [vmem:[#allocation2 + $0xa8] sm:$0xff] }
  0x41   :  { %709 = vmatpush.msrb.mxu2 %v2312_v10  ;;  %668 = vmatpush.msrb.mxu1 %v2308_v9  ;;  %v2516_v10 = vld [vmem:[#allocation2 + $0x90] sm:$0xff] }
  0x42   :  { %295 = vmatpush.msrb.mxu3 %v2492_v62  ;;  %336 = vmatpush.msrb.mxu0 %v2494_v63  ;;  %v2543_v63 = vld [vmem:[#allocation5 + $0xb8] sm:$0xff] }
  0x43   :  { %710 = vmatpush.msrb.mxu2 %v2322_v13  ;;  %669 = vmatpush.msrb.mxu1 %v2318_v12  ;;  %v2528_v13 = vld [vmem:[#allocation5 + $0x108] sm:$0xff]  ;;  %3669 = vst [vmem:[#allocation37_spill] sm:$0xff] %v2543_v63 }
  0x44   :  { %296 = vmatpush.msrb.mxu3 %v2499_v7  ;;  %337 = vmatpush.msrb.mxu0 %v2501_v4  ;;  %v2532_v4 = vld [vmem:[#allocation5 + $0x110] sm:$0xff] }
  0x45   :  { %189 = vmatmul.f32.gmra.mxu0 %v2506_v1  ;;  %711 = vmatpush.msrb.mxu2 %v2332_v16  ;;  %3667 = vst [vmem:[#allocation35_spill] sm:$0xff] %v2532_v4  ;;  %v2535_v16 = vld [vmem:[#allocation5 + $0xe0] sm:$0xff] }
  0x46   :  { %297 = vmatpush.msrb.mxu3 %v2508_v47  ;;  %338 = vmatpush.msrb.mxu0 %v2510_v44  ;;  %v2539_v44 = vld [vmem:[#allocation5 + $0xe8] sm:$0xff] }
  0x47   :  { %201 = vmatmul.f32.gmra.mxu3 %v2516_v10  ;;  %230 = vmatmul.f32.gmra.mxu1 %v2506_v1  ;;  %3668 = vst [vmem:[#allocation36_spill] sm:$0xff] %v2539_v44 }
  0x48   :  { %271 = vmatmul.f32.gmra.mxu2 %v2506_v1  ;;  %298 = vmatpush.msrb.mxu3 %v2519_v41 }
  0x49   :  { %339 = vmatpush.msrb.mxu0 %v2524_v38  ;;  %712 = vmatpush.msrb.mxu2 %v2342_v19  ;;  %v2549_v38 = vld [vmem:[#allocation5 + $0xc0] sm:$0xff]  ;;  %v2558_v19 = vld [vmem:[#allocation5 + $0x90] sm:$0xff] }
  0x4a   :  { %299 = vmatpush.msrb.mxu3 %v2528_v13  ;;  %670 = vmatpush.msrb.mxu1 %v2328_v15  ;;  %3670 = vst [vmem:[#allocation38_spill] sm:$0xff] %v2549_v38 }
  0x4b   :  { %340 = vmatpush.msrb.mxu0 %v2532_v4  ;;  %713 = vmatpush.msrb.mxu2 %v2352_v22  ;;  %3671 = vst [vmem:[#allocation39_spill] sm:$0xff] %v2558_v19  ;;  %v2560_v4 = vld [vmem:[#allocation5 + $0x98] sm:$0xff]  ;;  %v2566_v22 = vld [vmem:[#allocation5 + $0x68] sm:$0xff] }
  0x4c   :  { %300 = vmatpush.msrb.mxu3 %v2535_v16  ;;  %671 = vmatpush.msrb.mxu1 %v2338_v18  ;;  %3672 = vst [vmem:[#allocation40_spill] sm:$0xff] %v2566_v22  ;;  %v2582_v18 = vld [vmem:[#allocation5 + $0x20] sm:$0xff] }
  0x4d   :  { %341 = vmatpush.msrb.mxu0 %v2539_v44  ;;  %714 = vmatpush.msrb.mxu2 %v2362_v25  ;;  %v2568_v44 = vld [vmem:[#allocation5 + $0x70] sm:$0xff]  ;;  %v2572_v25 = vld [vmem:[#allocation5 + $0x40] sm:$0xff] }
  0x4e   :  { %301 = vmatpush.msrb.mxu3 %v2543_v63  ;;  %192 = vmatmul.f32.gmra.mxu0 %v2545_v35  ;;  %3673 = vst [vmem:[#allocation41_spill] sm:$0xff] %v2572_v25  ;;  %v2574_v63 = vld [vmem:[#allocation5 + $0x48] sm:$0xff] }
  0x4f   :  { %342 = vmatpush.msrb.mxu0 %v2549_v38  ;;  %204 = vmatmul.f32.gmra.mxu3 %v2551_v61  ;;  %v2580_v38 = vld [vmem:[#allocation5 + $0x18] sm:$0xff] }
  0x50   :  { %233 = vmatmul.f32.gmra.mxu1 %v2545_v35  ;;  %274 = vmatmul.f32.gmra.mxu2 %v2545_v35 }
  0x51   :  { %302 = vmatpush.msrb.mxu3 %v2558_v19  ;;  %343 = vmatpush.msrb.mxu0 %v2560_v4 }
  0x52   :  { %672 = vmatpush.msrb.mxu1 %v2348_v21  ;;  %715 = vmatpush.msrb.mxu2 %v2372_v28 }
  0x53   :  { %303 = vmatpush.msrb.mxu3 %v2566_v22  ;;  %344 = vmatpush.msrb.mxu0 %v2568_v44 }
  0x54   :  { %673 = vmatpush.msrb.mxu1 %v2358_v24  ;;  %716 = vmatpush.msrb.mxu2 %v2382_v31 }
  0x55   :  { %304 = vmatpush.msrb.mxu3 %v2572_v25  ;;  %345 = vmatpush.msrb.mxu0 %v2574_v63 }
  0x56   :  { %674 = vmatpush.msrb.mxu1 %v2368_v27  ;;  %717 = vmatpush.msrb.mxu2 %v2392_v34 }
  0x57   :  { %305 = vmatpush.msrb.mxu3 %v2580_v38  ;;  %346 = vmatpush.msrb.mxu0 %v2582_v18 }
  0x58   :  { %236 = vmatmul.f32.gmra.mxu1 %v2440_v49  ;;  %277 = vmatmul.f32.gmra.mxu2 %v2440_v49 }
  0x59   :  { %306 = vmatmul.f32.vlgmr.msrb.gmra.mxu3 %v2438_v48  ;;  %347 = vmatmul.f32.vlgmr.msrb.gmra.mxu0 %v2438_v48  ;;  %v3681_v48 = vld [vmem:[#allocation27_spill] sm:$0xff] }
  0x5a   :  { %747 = vmatpush.msra.mxu3 %v2286_v2  ;;  %788 = vmatpush.msra.mxu0 %v2446_v50 }
  0x5b   :  { %675 = vmatpush.msrb.mxu1 %v2378_v30  ;;  %718 = vmatpush.msrb.mxu2 %v2402_v37 }
  0x5c   :  { %748 = vmatpush.msra.mxu3 %v2294_v5  ;;  %789 = vmatpush.msra.mxu0 %v2454_v52 }
  0x5d   :  { %676 = vmatpush.msrb.mxu1 %v2388_v33  ;;  %719 = vmatpush.msrb.mxu2 %v2412_v40 }
  0x5e   :  { %749 = vmatpush.msra.mxu3 %v2304_v8  ;;  %790 = vmatpush.msra.mxu0 %v2461_v54 }
  0x5f   :  { %677 = vmatpush.msrb.mxu1 %v2398_v36  ;;  %720 = vmatpush.msrb.mxu2 %v2422_v43 }
  0x60   :  { %239 = vmatmul.f32.gmra.mxu1 %v2477_v59  ;;  %280 = vmatmul.f32.gmra.mxu2 %v2477_v59 }
  0x61   :  { %309 = vmatmul.f32.gmra.mxu3 %v2471_v57  ;;  %350 = vmatmul.f32.gmra.mxu0 %v2471_v57  ;;  %v3682_v57 = vld [vmem:[#allocation33_spill] sm:$0xff] }
  0x62   :  { %750 = vmatpush.msra.mxu3 %v2314_v11  ;;  %791 = vmatpush.msra.mxu0 %v2469_v56 }
  0x63   :  { %678 = vmatpush.msrb.mxu1 %v2408_v39  ;;  %721 = vmatpush.msrb.mxu2 %v2432_v46 }
  0x64   :  { %751 = vmatpush.msra.mxu3 %v2324_v14  ;;  %792 = vmatpush.msra.mxu0 %v2484_v60 }
  0x65   :  { %679 = vmatpush.msrb.mxu1 %v2418_v42  ;;  %1203 = vmatpush.msra.mxu2 %v2282_v0  ;;  %v2650_v0 = vld [vmem:[#allocation2 + $0x8] sm:$0xff] }
  0x66   :  { %752 = vmatpush.msra.mxu3 %v2334_v17  ;;  %793 = vmatpush.msra.mxu0 %v2492_v62 }
  0x67   :  { %680 = vmatpush.msrb.mxu1 %v2428_v45  ;;  %1204 = vmatpush.msra.mxu2 %v2290_v3  ;;  %v3675_v3 = vld [vmem:[#allocation21_spill] sm:$0xff] }
  0x68   :  { %242 = vmatmul.f32.gmra.mxu1 %v2516_v10  ;;  %283 = vmatmul.f32.gmra.mxu2 %v2516_v10 }
  0x69   :  { %312 = vmatmul.f32.gmra.mxu3 %v2506_v1  ;;  %353 = vmatmul.f32.gmra.mxu0 %v2506_v1  ;;  %v3674_v1 = vld [vmem:[#allocation30_spill] sm:$0xff] }
  0x6a   :  { %753 = vmatpush.msra.mxu3 %v2344_v20  ;;  %794 = vmatpush.msra.mxu0 %v2499_v7 }
  0x6b   :  { %829 = vmatpush.msra.mxu1 %v2450_v51  ;;  %1205 = vmatpush.msra.mxu2 %v2298_v6  ;;  %v3676_v6 = vld [vmem:[#allocation25_spill] sm:$0xff] }
  0x6c   :  { %754 = vmatpush.msra.mxu3 %v2354_v23  ;;  %795 = vmatpush.msra.mxu0 %v2508_v47 }
  0x6d   :  { %830 = vmatpush.msra.mxu1 %v2458_v53  ;;  %1206 = vmatpush.msra.mxu2 %v2308_v9  ;;  %v3677_v9 = vld [vmem:[#allocation37_spill] sm:$0xff] }
  0x6e   :  { %755 = vmatpush.msra.mxu3 %v2364_v26  ;;  %796 = vmatpush.msra.mxu0 %v2519_v41 }
  0x6f   :  { %831 = vmatpush.msra.mxu1 %v2466_v55  ;;  %1207 = vmatpush.msra.mxu2 %v2318_v12  ;;  %v3678_v12 = vld [vmem:[#allocation31_spill] sm:$0xff] }
  0x70   :  { %245 = vmatmul.f32.gmra.mxu1 %v2551_v61  ;;  %286 = vmatmul.f32.gmra.mxu2 %v2551_v61 }
  0x71   :  { %315 = vmatmul.f32.gmra.mxu3 %v2545_v35  ;;  %356 = vmatmul.f32.gmra.mxu0 %v2545_v35  ;;  %v3680_v35 = vld [vmem:[#allocation32_spill] sm:$0xff] }
  0x72   :  { %756 = vmatpush.msra.mxu3 %v2374_v29  ;;  %797 = vmatpush.msra.mxu0 %v2528_v13 }
  0x73   :  { %832 = vmatpush.msra.mxu1 %v2475_v58  ;;  %1208 = vmatpush.msra.mxu2 %v2328_v15  ;;  %v3679_v15 = vld [vmem:[#allocation26_spill] sm:$0xff] }
  0x74   :  { %757 = vmatpush.msra.mxu3 %v2384_v32  ;;  %798 = vmatpush.msra.mxu0 %v2535_v16 }
  0x75   :  { %833 = vmatpush.msra.mxu1 %v3674_v1  ;;  %1209 = vmatpush.msra.mxu2 %v3675_v3  ;;  %v3683_v3 = vld [vmem:[#allocation28_spill] sm:$0xff] }
  0x76   :  { %758 = vmatpush.msra.mxu3 %v3676_v6  ;;  %799 = vmatpush.msra.mxu0 %v3677_v9 }
  0x77   :  { %834 = vmatpush.msra.mxu1 %v3678_v12  ;;  %1210 = vmatpush.msra.mxu2 %v2348_v21  ;;  %v2668_v21 = vld [vmem:[#allocation2 + $0x20] sm:$0xff] }
  0x78   :  { %681 = vmatmul.f32.vlgmr.msrb.gmra.mxu1 %v2650_v0  ;;  %722 = vmatmul.f32.vlgmr.msrb.gmra.mxu2 %v2650_v0 }
  0x79   :  { %318 = vmatmul.f32.gmra.mxu3 %v2440_v49  ;;  %359 = vmatmul.f32.gmra.mxu0 %v2440_v49  ;;  %v3684_v49 = vld [vmem:[#allocation34_spill] sm:$0xff] }
  0x7a   :  { %759 = vmatpush.msra.mxu3 %v3679_v15  ;;  %800 = vmatpush.msra.mxu0 %v2558_v19  ;;  %v3689_v19 = vld [vmem:[#allocation36_spill] sm:$0xff] }
  0x7b   :  { %835 = vmatpush.msra.mxu1 %v3680_v35  ;;  %1211 = vmatpush.msra.mxu2 %v2358_v24  ;;  %v3685_v24 = vld [vmem:[#allocation29_spill] sm:$0xff] }
  0x7c   :  { %760 = vmatpush.msra.mxu3 %v3681_v48  ;;  %801 = vmatpush.msra.mxu0 %v2566_v22  ;;  %v3688_v22 = vld [vmem:[#allocation16_spill] sm:$0xff] }
  0x7d   :  { %836 = vmatpush.msra.mxu1 %v3682_v57  ;;  %1212 = vmatpush.msra.mxu2 %v2368_v27  ;;  %v3686_v27 = vld [vmem:[#allocation15_spill] sm:$0xff] }
  0x7e   :  { %761 = vmatpush.msra.mxu3 %v3683_v3  ;;  %802 = vmatpush.msra.mxu0 %v2572_v25  ;;  %v3687_v25 = vld [vmem:[#allocation35_spill] sm:$0xff] }
  0x7f   :  { %837 = vmatpush.msra.mxu1 %v3684_v49  ;;  %1213 = vmatpush.msra.mxu2 %v2378_v30  ;;  %v2686_v30 = vld [vmem:[#allocation2 + $0x38] sm:$0xff] }
  0x80   :  { %684 = vmatmul.f32.gmra.mxu1 %v2668_v21  ;;  %725 = vmatmul.f32.gmra.mxu2 %v2668_v21 }
  0x81   :  { %321 = vmatmul.f32.gmra.mxu3 %v2477_v59  ;;  %362 = vmatmul.f32.gmra.mxu0 %v2477_v59  ;;  %v3690_v59 = vld [vmem:[#allocation17_spill] sm:$0xff] }
  0x82   :  { %762 = vmatpush.msra.mxu3 %v3685_v24  ;;  %803 = vmatpush.msra.mxu0 %v2580_v38 }
  0x83   :  { %838 = vmatpush.msra.mxu1 %v3687_v25  ;;  %1214 = vmatpush.msra.mxu2 %v2388_v33  ;;  %v3694_v33 = vld [vmem:[#allocation20_spill] sm:$0xff] }
  0x84   :  { %1244 = vmatpush.msrb.mxu3 %v3686_v27  ;;  %1285 = vmatpush.msrb.mxu0 %v2286_v2  ;;  %v3691_v2 = vld [vmem:[#allocation18_spill] sm:$0xff] }
  0x85   :  { %839 = vmatpush.msra.mxu1 %v3689_v19  ;;  %1215 = vmatpush.msra.mxu2 %v2398_v36 }
  0x86   :  { %1245 = vmatpush.msrb.mxu3 %v3688_v22  ;;  %1286 = vmatpush.msrb.mxu0 %v2294_v5  ;;  %v3692_v5 = vld [vmem:[#allocation38_spill] sm:$0xff]  ;;  %v3693_v22 = vld [vmem:[#allocation19_spill] sm:$0xff] }
  0x87   :  { %840 = vmatpush.msra.mxu1 %v3692_v5  ;;  %1216 = vmatpush.msra.mxu2 %v2408_v39  ;;  %v2810_v39 = vld [vmem:[#allocation8] sm:$0xff] }
  0x88   :  { %1246 = vmatpush.msrb.mxu3 %v3690_v59  ;;  %1287 = vmatpush.msrb.mxu0 %v2304_v8  ;;  %v2704_v8 = vld [vmem:[#allocation2 + $0x50] sm:$0xff] }
  0x89   :  { %687 = vmatmul.f32.gmra.mxu1 %v2686_v30  ;;  %728 = vmatmul.f32.gmra.mxu2 %v2686_v30 }
  0x8a   :  { %324 = vmatmul.f32.gmra.mxu3 %v2516_v10  ;;  %365 = vmatmul.f32.gmra.mxu0 %v2516_v10  ;;  %v3695_v10 = vld [vmem:[#allocation22_spill] sm:$0xff] }
  0x8b   :  { %1247 = vmatpush.msrb.mxu3 %v3691_v2  ;;  %1288 = vmatpush.msrb.mxu0 %v2314_v11  ;;  %v3696_v11 = vld [vmem:[#allocation23_spill] sm:$0xff] }
  0x8c   :  { %841 = vmatpush.msra.mxu1 %v2560_v4  ;;  %1217 = vmatpush.msra.mxu2 %v2418_v42  ;;  %v3699_v42 = vld [vmem:[#allocation40_spill] sm:$0xff] }
  0x8d   :  { %1248 = vmatpush.msrb.mxu3 %v3693_v22  ;;  %1289 = vmatpush.msrb.mxu0 %v2324_v14  ;;  %v2722_v14 = vld [vmem:[#allocation2 + $0x68] sm:$0xff] }
  0x8e   :  { %842 = vmatpush.msra.mxu1 %v2568_v44  ;;  %1218 = vmatpush.msra.mxu2 %v2428_v45  ;;  %v2816_v45 = vld [vmem:[#allocation2 + $0x28] sm:$0xff] }
  0x8f   :  { %1249 = vmatpush.msrb.mxu3 %v3694_v33  ;;  %1290 = vmatpush.msrb.mxu0 %v2334_v17  ;;  %v3697_v17 = vld [vmem:[#allocation24_spill] sm:$0xff] }
  0x90   :  { %843 = vmatpush.msra.mxu1 %v2574_v63  ;;  %1367 = vmatpush.msrb.mxu2 %v2450_v51 }
  0x91   :  { %690 = vmatmul.f32.gmra.mxu1 %v2704_v8  ;;  %731 = vmatmul.f32.gmra.mxu2 %v2704_v8 }
  0x92   :  { %327 = vmatmul.f32.gmra.mxu3 %v2551_v61  ;;  %368 = vmatmul.f32.gmra.mxu0 %v2551_v61  ;;  %v2837_v61 = vld [vmem:[#allocation2 + $0x40] sm:$0xff] }
  0x93   :  { %1250 = vmatpush.msrb.mxu3 %v3695_v10  ;;  %1291 = vmatpush.msrb.mxu0 %v2344_v20  ;;  %v2740_v20 = vld [vmem:[#allocation2 + $0x80] sm:$0xff] }
  0x94   :  { %844 = vmatpush.msra.mxu1 %v2582_v18  ;;  %1368 = vmatpush.msrb.mxu2 %v2458_v53 }
  0x95   :  { %1251 = vmatpush.msrb.mxu3 %v3696_v11  ;;  %1292 = vmatpush.msrb.mxu0 %v2354_v23  ;;  %v2758_v23 = vld [vmem:[#allocation2 + $0x98] sm:$0xff] }
  0x96   :  { %1987 = vmatpush.msrb.mxu1 %v2446_v50  ;;  %1369 = vmatpush.msrb.mxu2 %v2466_v55 }
  0x97   :  { %1252 = vmatpush.msrb.mxu3 %v3697_v17  ;;  %1293 = vmatpush.msrb.mxu0 %v2364_v26  ;;  %v2776_v26 = vld [vmem:[#allocation2 + $0xb0] sm:$0xff] }
  0x98   :  { %1988 = vmatpush.msrb.mxu1 %v2454_v52  ;;  %1370 = vmatpush.msrb.mxu2 %v2475_v58 }
  0x99   :  { %693 = vmatmul.f32.gmra.mxu1 %v2722_v14  ;;  %734 = vmatmul.f32.gmra.mxu2 %v2722_v14 }
  0x9a   :  { %763 = vmatmul.f32.vlgmr.msra.gmra.mxu3 %v2650_v0  ;;  %804 = vmatmul.f32.vlgmr.msra.gmra.mxu0 %v2650_v0 }
  0x9b   :  { %1253 = vmatpush.msrb.mxu3 %v2372_v28  ;;  %1294 = vmatpush.msrb.mxu0 %v2374_v29 }
  0x9c   :  { %1989 = vmatpush.msrb.mxu1 %v2461_v54  ;;  %1371 = vmatpush.msrb.mxu2 %v3674_v1 }
  0x9d   :  { %1254 = vmatpush.msrb.mxu3 %v2382_v31  ;;  %1295 = vmatpush.msrb.mxu0 %v2384_v32  ;;  %v2794_v31 = vld [vmem:[#allocation2 + $0x10] sm:$0xff] }
  0x9e   :  { %1990 = vmatpush.msrb.mxu1 %v2469_v56  ;;  %1372 = vmatpush.msrb.mxu2 %v3678_v12 }
  0x9f   :  { %1255 = vmatpush.msrb.mxu3 %v2392_v34  ;;  %1296 = vmatpush.msrb.mxu0 %v3676_v6 }
  0xa0   :  { %1991 = vmatpush.msrb.mxu1 %v2484_v60  ;;  %1373 = vmatpush.msrb.mxu2 %v3680_v35 }
  0xa1   :  { %696 = vmatmul.f32.gmra.mxu1 %v2740_v20  ;;  %737 = vmatmul.f32.gmra.mxu2 %v2740_v20 }
  0xa2   :  { %766 = vmatmul.f32.gmra.mxu3 %v2668_v21  ;;  %807 = vmatmul.f32.gmra.mxu0 %v2668_v21 }
  0xa3   :  { %1256 = vmatpush.msrb.mxu3 %v2402_v37  ;;  %1297 = vmatpush.msrb.mxu0 %v3679_v15  ;;  %v3698_v37 = vld [vmem:[#allocation39_spill] sm:$0xff] }
  0xa4   :  { %1992 = vmatpush.msrb.mxu1 %v2492_v62  ;;  %1374 = vmatpush.msrb.mxu2 %v3682_v57 }
  0xa5   :  { %1257 = vmatpush.msrb.mxu3 %v2412_v40  ;;  %1298 = vmatpush.msrb.mxu0 %v3681_v48 }
  0xa6   :  { %1993 = vmatpush.msrb.mxu1 %v2499_v7  ;;  %1375 = vmatpush.msrb.mxu2 %v3684_v49 }
  0xa7   :  { %1258 = vmatpush.msrb.mxu3 %v2422_v43  ;;  %1299 = vmatpush.msrb.mxu0 %v3683_v3  ;;  %v2814_v43 = vld [vmem:[#allocation8 + $0x8] sm:$0xff] }
  0xa8   :  { %1994 = vmatpush.msrb.mxu1 %v2508_v47  ;;  %1376 = vmatpush.msrb.mxu2 %v3687_v25 }
  0xa9   :  { %699 = vmatmul.f32.gmra.mxu1 %v2758_v23  ;;  %740 = vmatmul.f32.gmra.mxu2 %v2758_v23 }
  0xaa   :  { %769 = vmatmul.f32.gmra.mxu3 %v2686_v30  ;;  %810 = vmatmul.f32.gmra.mxu0 %v2686_v30 }
  0xab   :  { %1259 = vmatpush.msrb.mxu3 %v2432_v46  ;;  %1300 = vmatpush.msrb.mxu0 %v3685_v24  ;;  %v3700_v46 = vld [vmem:[#allocation41_spill] sm:$0xff] }
  0xac   :  { %1995 = vmatpush.msrb.mxu1 %v2519_v41  ;;  %1377 = vmatpush.msrb.mxu2 %v3689_v19 }
  0xad   :  { %1326 = vmatpush.msra.mxu0 %v2446_v50  ;;  %2003 = vmatpush.msra.mxu3 %v2450_v51 }
  0xae   :  { %1996 = vmatpush.msrb.mxu1 %v2528_v13  ;;  %1378 = vmatpush.msrb.mxu2 %v3692_v5 }
  0xaf   :  { %1327 = vmatpush.msra.mxu0 %v2454_v52  ;;  %2004 = vmatpush.msra.mxu3 %v2458_v53  ;;  %v2828_v52 = vld [vmem:[#allocation8 + $0x10] sm:$0xff] }
  0xb0   :  { %1997 = vmatpush.msrb.mxu1 %v2535_v16  ;;  %1379 = vmatpush.msrb.mxu2 %v2560_v4 }
  0xb1   :  { %1328 = vmatpush.msra.mxu0 %v2461_v54  ;;  %2005 = vmatpush.msra.mxu3 %v2466_v55 }
  0xb2   :  { %702 = vmatmul.f32.gmra.mxu1 %v2776_v26  ;;  %743 = vmatmul.f32.gmra.mxu2 %v2776_v26  ;;  %v184_v28 = vpop.f32.mrf.mxu0 }
  0xb3   :  { %772 = vmatmul.f32.gmra.mxu3 %v2704_v8  ;;  %813 = vmatmul.f32.gmra.mxu0 %v2704_v8  ;;  %v225_v29 = vpop.f32.mrf.mxu1 }
  0xb4   :  { %1329 = vmatpush.msra.mxu0 %v2469_v56  ;;  %2006 = vmatpush.msra.mxu3 %v2475_v58  ;;  %v378_v50 = vadd.f32 %v2814_v43, %v225_v29 }
  0xb5   :  { %1998 = vmatpush.msrb.mxu1 %v3677_v9  ;;  %1380 = vmatpush.msrb.mxu2 %v2568_v44 }
  0xb6   :  { %1330 = vmatpush.msra.mxu0 %v2484_v60  ;;  %2007 = vmatpush.msra.mxu3 %v3674_v1  ;;  %v423_v55 = vrot.slane %v378_v50, 4 }
  0xb7   :  { %1999 = vmatpush.msrb.mxu1 %v3698_v37  ;;  %1381 = vmatpush.msrb.mxu2 %v2574_v63 }
  0xb8   :  { %1331 = vmatpush.msra.mxu0 %v2492_v62  ;;  %2008 = vmatpush.msra.mxu3 %v3678_v12  ;;  %v196_v32 = vpop.f32.mrf.mxu3 }
  0xb9   :  { %v266_v34 = vpop.f32.mrf.mxu2  ;;  %2000 = vmatpush.msrb.mxu1 %v3699_v42  ;;  %1382 = vmatpush.msrb.mxu2 %v2582_v18  ;;  %v397_v51 = vadd.f32 %v2810_v39, %v196_v32 }
  0xba   :  { %845 = vmatmul.f32.vlgmr.msra.gmra.mxu1 %v2650_v0  ;;  %1219 = vmatmul.f32.vlgmr.msra.gmra.mxu2 %v2794_v31  ;;  %v187_v36 = vpop.f32.mrf.mxu0  ;;  %v379_v56 = vadd.f32 %v2828_v52, %v266_v34 }
  0xbb   :  { %775 = vmatmul.f32.gmra.mxu3 %v2722_v14  ;;  %816 = vmatmul.f32.gmra.mxu0 %v2722_v14  ;;  %v537_v60 = vrot.slane %v397_v51, 4  ;;  %v382_v62 = vadd.f32 %v2810_v39, %v187_v36 }
  0xbc   :  { %1332 = vmatpush.msra.mxu0 %v2499_v7  ;;  %2009 = vmatpush.msra.mxu3 %v3680_v35  ;;  %v228_v40 = vpop.f32.mrf.mxu1  ;;  %v377_v7 = vadd.f32 %v2810_v39, %v184_v28  ;;  %v429_v1 = vrot.slane %v379_v56, 4 }
  0xbd   :  { %2001 = vmatpush.msrb.mxu1 %v3700_v46 }
  0xbe   :  { %1333 = vmatpush.msra.mxu0 %v2508_v47  ;;  %2010 = vmatpush.msra.mxu3 %v3682_v57  ;;  %v430_v48 = vmax.f32 %v379_v56, %v429_v1 }
  0xbf   :  { %2002 = vmatpush.msrb.mxu1 %v2580_v38 }
  0xc0   :  { %1334 = vmatpush.msra.mxu0 %v2519_v41  ;;  %2011 = vmatpush.msra.mxu3 %v3684_v49  ;;  %v417_v41 = vrot.slane %v377_v7, 4  ;;  %v431_v33 = vrot.slane %v430_v48, 2 }
  0xc1   :  { %v199_v47 = vpop.f32.mrf.mxu3 }
  0xc2   :  { %848 = vmatmul.f32.gmra.mxu1 %v2668_v21  ;;  %1222 = vmatmul.f32.gmra.mxu2 %v2816_v45  ;;  %v269_v53 = vpop.f32.mrf.mxu2  ;;  %v190_v54 = vpop.f32.mrf.mxu0  ;;  %v418_v0 = vmax.f32 %v377_v7, %v417_v41  ;;  %v402_v21 = vadd.f32 %v2810_v39, %v199_v47 }
  0xc3   :  { %778 = vmatmul.f32.gmra.mxu3 %v2740_v20  ;;  %819 = vmatmul.f32.gmra.mxu0 %v2740_v20  ;;  %v384_v49 = vadd.f32 %v2828_v52, %v269_v53  ;;  %v387_v24 = vadd.f32 %v2810_v39, %v190_v54 }
  0xc4   :  { %1335 = vmatpush.msra.mxu0 %v2528_v13  ;;  %2012 = vmatpush.msra.mxu3 %v3687_v25  ;;  %v231_v58 = vpop.f32.mrf.mxu1  ;;  %v383_v13 = vadd.f32 %v2814_v43, %v228_v40  ;;  %v424_v25 = vmax.f32 %v378_v50, %v423_v55  ;;  %v2869_v55 = vld [vmem:[#allocation2 + $0x70] sm:$0xff] }
  0xc5   :  { %v388_v59 = vadd.f32 %v2814_v43, %v231_v58  ;;  %v459_v17 = vrot.slane %v384_v49, 4  ;;  %v477_v28 = vrot.slane %v387_v24, 4 }
  0xc6   :  { %1336 = vmatpush.msra.mxu0 %v2535_v16  ;;  %2013 = vmatpush.msra.mxu3 %v3689_v19  ;;  %v538_v16 = vmax.f32 %v397_v51, %v537_v60  ;;  %v447_v19 = vrot.slane %v382_v62, 4  ;;  %v453_v12 = vrot.slane %v383_v13, 4  ;;  %v425_v35 = vrot.slane %v424_v25, 2 }
  0xc7   :  { %v483_v32 = vrot.slane %v388_v59, 4  ;;  %v460_v47 = vmax.f32 %v384_v49, %v459_v17  ;;  %v478_v53 = vmax.f32 %v387_v24, %v477_v28  ;;  %v2891_v17 = vld [vmem:[#allocation8 + $0x18] sm:$0xff]  ;;  %v2893_v28 = vld [vmem:[#allocation2 + $0x88] sm:$0xff] }
  0xc8   :  { %1337 = vmatpush.msra.mxu0 %v3677_v9  ;;  %2014 = vmatpush.msra.mxu3 %v3692_v5  ;;  %v419_v9 = vrot.slane %v418_v0, 2  ;;  %v539_v3 = vrot.slane %v538_v16, 2  ;;  %v454_v5 = vmax.f32 %v383_v13, %v453_v12  ;;  %v426_v22 = vmax.f32 %v424_v25, %v425_v35 }
  0xc9   :  { %v484_v58 = vmax.f32 %v388_v59, %v483_v32 }
  0xca   :  { %851 = vmatmul.f32.gmra.mxu1 %v2686_v30  ;;  %1225 = vmatmul.f32.gmra.mxu2 %v2837_v61  ;;  %v202_v6 = vpop.f32.mrf.mxu3  ;;  %v2855_v30 = vld [vmem:[#allocation2 + $0x58] sm:$0xff]  ;;  %v420_v2 = vmax.f32 %v418_v0, %v419_v9  ;;  %v540_v11 = vmax.f32 %v538_v16, %v539_v3  ;;  %v479_v9 = vrot.slane %v478_v53, 2 }
  0xcb   :  { %781 = vmatmul.f32.gmra.mxu3 %v2758_v23  ;;  %822 = vmatmul.f32.gmra.mxu0 %v2758_v23  ;;  %v272_v15 = vpop.f32.mrf.mxu2  ;;  %v193_v57 = vpop.f32.mrf.mxu0  ;;  %v407_v10 = vadd.f32 %v2810_v39, %v202_v6  ;;  %v461_v6 = vrot.slane %v460_v47, 2 }
  0xcc   :  { %1338 = vmatpush.msra.mxu0 %v3698_v37  ;;  %2015 = vmatpush.msra.mxu3 %v2560_v4  ;;  %v448_v4 = vmax.f32 %v382_v62, %v447_v19  ;;  %v389_v29 = vadd.f32 %v2828_v52, %v272_v15  ;;  %v392_v34 = vadd.f32 %v2810_v39, %v193_v57  ;;  %v455_v37 = vrot.slane %v454_v5, 2  ;;  %v2880_v15 = vld [vmem:[#allocation8 + $0x20] sm:$0xff] }
  0xcd   :  { %v234_v27 = vpop.f32.mrf.mxu1  ;;  %v597_v50 = vrot.slane %v407_v10, 4  ;;  %v541_v51 = vrot.slane %v540_v11, 1 }
  0xce   :  { %1339 = vmatpush.msra.mxu0 %v3699_v42  ;;  %2016 = vmatpush.msra.mxu3 %v2568_v44  ;;  %v567_v44 = vrot.slane %v402_v21, 4  ;;  %v427_v42 = vrot.slane %v426_v22, 1  ;;  %v489_v54 = vrot.slane %v389_v29, 4  ;;  %v507_v60 = vrot.slane %v392_v34, 4 }
  0xcf   :  { %v456_v0 = vmax.f32 %v454_v5, %v455_v37  ;;  %v598_v16 = vmax.f32 %v407_v10, %v597_v50  ;;  %v2878_v19 = vmax.f32 %v540_v11, %v541_v51 }
  0xd0   :  { %1340 = vmatpush.msra.mxu0 %v3700_v46  ;;  %2017 = vmatpush.msra.mxu3 %v2574_v63  ;;  %v449_v63 = vrot.slane %v448_v4, 2  ;;  %v432_v46 = vmax.f32 %v430_v48, %v431_v33  ;;  %v568_v7 = vmax.f32 %v402_v21, %v567_v44  ;;  %v2874_v13 = vmax.f32 %v426_v22, %v427_v42 }
  0xd1   :  { %v490_v12 = vmax.f32 %v389_v29, %v489_v54  ;;  %v485_v48 = vrot.slane %v484_v58, 2  ;;  %v508_v21 = vmax.f32 %v392_v34, %v507_v60  ;;  %v457_v3 = vrot.slane %v456_v0, 1 }
  0xd2   :  { %854 = vmatmul.f32.gmra.mxu1 %v2704_v8  ;;  %1228 = vmatmul.f32.gmra.mxu2 %v2855_v30  ;;  %v205_v36 = vpop.f32.mrf.mxu3  ;;  %v421_v8 = vrot.slane %v420_v2, 1  ;;  %v450_v56 = vmax.f32 %v448_v4, %v449_v63  ;;  %v433_v25 = vrot.slane %v432_v46, 1  ;;  %v569_v1 = vrot.slane %v568_v7, 2 }
  0xd3   :  { %784 = vmatmul.f32.gmra.mxu3 %v2776_v26  ;;  %825 = vmatmul.f32.gmra.mxu0 %v2776_v26  ;;  %v275_v40 = vpop.f32.mrf.mxu2  ;;  %v462_v33 = vmax.f32 %v460_v47, %v461_v6  ;;  %v480_v44 = vmax.f32 %v478_v53, %v479_v9  ;;  %v491_v10 = vrot.slane %v490_v12, 2  ;;  %v486_v63 = vmax.f32 %v484_v58, %v485_v48 }
  0xd4   :  { %1341 = vmatpush.msra.mxu0 %v2580_v38  ;;  %2018 = vmatpush.msra.mxu3 %v2582_v18  ;;  %v393_v38 = vadd.f32 %v2814_v43, %v234_v27  ;;  %v2872_v62 = vmax.f32 %v420_v2, %v421_v8  ;;  %v451_v35 = vrot.slane %v450_v56, 1  ;;  %v394_v49 = vadd.f32 %v2828_v52, %v275_v40 }
  0xd5   :  { %v237_v41 = vpop.f32.mrf.mxu1  ;;  %v2887_v4 = vmax.f32 %v432_v46, %v433_v25  ;;  %v570_v59 = vmax.f32 %v568_v7, %v569_v1  ;;  %v599_v2 = vrot.slane %v598_v16, 2  ;;  %v509_v32 = vrot.slane %v508_v21, 2 }
  0xd6   :  { %v348_v18 = vpop.f32.mrf.mxu0  ;;  %v513_v57 = vrot.slane %v393_v38, 4  ;;  %v398_v24 = vadd.f32 %v2814_v43, %v237_v41  ;;  %v2895_v29 = vmax.f32 %v450_v56, %v451_v35  ;;  %v2897_v8 = vmax.f32 %v456_v0, %v457_v3 }
  0xd7   :  { %v381_v5 = vadd.f32 %v2880_v15, %v348_v18  ;;  %v519_v40 = vrot.slane %v394_v49, 4  ;;  %v571_v46 = vrot.slane %v570_v59, 1  ;;  %v600_v7 = vmax.f32 %v598_v16, %v599_v2  ;;  %v2912_v2 = vld [vmem:[#allocation2 + $0xa0] sm:$0xff] }
  0xd8   :  { %v514_v34 = vmax.f32 %v393_v38, %v513_v57  ;;  %v543_v42 = vrot.slane %v398_v24, 4  ;;  %v463_v47 = vrot.slane %v462_v33, 1  ;;  %v481_v53 = vrot.slane %v480_v44, 1 }
  0xd9   :  { %v441_v50 = vrot.slane %v381_v5, 4  ;;  %v492_v54 = vmax.f32 %v490_v12, %v491_v10  ;;  %v487_v56 = vrot.slane %v486_v63, 1  ;;  %v510_v58 = vmax.f32 %v508_v21, %v509_v32 }
  0xda   :  { %857 = vmatmul.f32.gmra.mxu1 %v2722_v14  ;;  %1231 = vmatmul.f32.gmra.mxu2 %v2869_v55  ;;  %v412_v14 = vadd.f32 %v2810_v39, %v205_v36  ;;  %v515_v60 = vrot.slane %v514_v34, 2  ;;  %v520_v0 = vmax.f32 %v394_v49, %v519_v40  ;;  %v544_v25 = vmax.f32 %v398_v24, %v543_v42 }
  0xdb   :  { %1260 = vmatmul.f32.vlgmr.msrb.gmra.mxu3 %v2794_v31  ;;  %1301 = vmatmul.f32.vlgmr.msrb.gmra.mxu0 %v2794_v31  ;;  %v278_v27 = vpop.f32.mrf.mxu2  ;;  %v2906_v16 = vmax.f32 %v570_v59, %v571_v46  ;;  %v601_v6 = vrot.slane %v600_v7, 1  ;;  %v442_v9 = vmax.f32 %v381_v5, %v441_v50  ;;  %v2908_v48 = vmax.f32 %v462_v33, %v463_v47 }
  0xdc   :  { %v307_v22 = vpop.f32.mrf.mxu3  ;;  %v399_v11 = vadd.f32 %v2828_v52, %v278_v27  ;;  %v627_v37 = vrot.slane %v412_v14, 4  ;;  %v2910_v57 = vmax.f32 %v480_v44, %v481_v53  ;;  %v493_v21 = vrot.slane %v492_v54, 1 }
  0xdd   :  { %v240_v39 = vpop.f32.mrf.mxu1  ;;  %v380_v51 = vadd.f32 %v2891_v17, %v307_v22  ;;  %v511_v49 = vrot.slane %v510_v58, 1  ;;  %v516_v24 = vmax.f32 %v514_v34, %v515_v60  ;;  %v545_v5 = vrot.slane %v544_v25, 2 }
  0xde   :  { %v351_v36 = vpop.f32.mrf.mxu0  ;;  %v549_v41 = vrot.slane %v399_v11, 4  ;;  %v403_v38 = vadd.f32 %v2814_v43, %v240_v39  ;;  %v628_v18 = vmax.f32 %v412_v14, %v627_v37  ;;  %v2914_v14 = vmax.f32 %v486_v63, %v487_v56 }
  0xdf   :  { %v435_v12 = vrot.slane %v380_v51, 4  ;;  %v521_v39 = vrot.slane %v520_v0, 2  ;;  %v443_v33 = vrot.slane %v442_v9, 2  ;;  %v2927_v42 = vmax.f32 %v510_v58, %v511_v49 }
  0xe0   :  { %v550_v3 = vmax.f32 %v399_v11, %v549_v41  ;;  %3701 = vst [vmem:[#allocation30_spill] sm:$0xff] %v2914_v14  ;;  %v573_v22 = vrot.slane %v403_v38, 4  ;;  %v629_v10 = vrot.slane %v628_v18, 2  ;;  %v2921_v11 = vmax.f32 %v492_v54, %v493_v21 }
  0xe1   :  { %v436_v44 = vmax.f32 %v380_v51, %v435_v12  ;;  %3703 = vst [vmem:[#allocation25_spill] sm:$0xff] %v2927_v42  ;;  %v517_v46 = vrot.slane %v516_v24, 1  ;;  %v522_v51 = vmax.f32 %v520_v0, %v521_v39  ;;  %v546_v47 = vmax.f32 %v544_v25, %v545_v5  ;;  %v2948_v42 = vld [vmem:[#allocation8 + $0x28] sm:$0xff] }
  0xe2   :  { %860 = vmatmul.f32.gmra.mxu1 %v2740_v20  ;;  %1234 = vmatmul.f32.gmra.mxu2 %v2893_v28  ;;  %v386_v20 = vadd.f32 %v2880_v15, %v351_v36  ;;  %v2916_v36 = vmax.f32 %v600_v7, %v601_v6  ;;  %3702 = vst [vmem:[#allocation21_spill] sm:$0xff] %v2921_v11  ;;  %v551_v63 = vrot.slane %v550_v3, 2 }
  0xe3   :  { %1263 = vmatmul.f32.gmra.mxu3 %v2816_v45  ;;  %1304 = vmatmul.f32.gmra.mxu0 %v2816_v45  ;;  %v281_v1 = vpop.f32.mrf.mxu2  ;;  %v574_v7 = vmax.f32 %v403_v38, %v573_v22  ;;  %v444_v41 = vmax.f32 %v442_v9, %v443_v33  ;;  %v437_v56 = vrot.slane %v436_v44, 2  ;;  %v2932_v38 = vld [vmem:[#allocation2 + $0xb8] sm:$0xff]  ;;  %v2934_v49 = vmax.f32 %v516_v24, %v517_v46 }
  0xe4   :  { %v310_v35 = vpop.f32.mrf.mxu3  ;;  %v471_v32 = vrot.slane %v386_v20, 4  ;;  %v404_v37 = vadd.f32 %v2828_v52, %v281_v1  ;;  %v552_v12 = vmax.f32 %v550_v3, %v551_v63  ;;  %v523_v22 = vrot.slane %v522_v51, 1 }
  0xe5   :  { %v243_v27 = vpop.f32.mrf.mxu1  ;;  %v385_v34 = vadd.f32 %v2891_v17, %v310_v35  ;;  %3704 = vst [vmem:[#allocation37_spill] sm:$0xff] %v2934_v49  ;;  %v438_v39 = vmax.f32 %v436_v44, %v437_v56  ;;  %v445_v33 = vrot.slane %v444_v41, 1 }
  0xe6   :  { %v354_v59 = vpop.f32.mrf.mxu0  ;;  %v408_v40 = vadd.f32 %v2814_v43, %v243_v27  ;;  %v472_v53 = vmax.f32 %v386_v20, %v471_v32  ;;  %v579_v60 = vrot.slane %v404_v37, 4  ;;  %v553_v24 = vrot.slane %v552_v12, 1 }
  0xe7   :  { %v391_v50 = vadd.f32 %v2880_v15, %v354_v59  ;;  %v465_v35 = vrot.slane %v385_v34, 4  ;;  %v547_v59 = vrot.slane %v546_v47, 1 }
  0xe8   :  { %v603_v21 = vrot.slane %v408_v40, 4  ;;  %v580_v5 = vmax.f32 %v404_v37, %v579_v60 }
  0xe9   :  { %v501_v0 = vrot.slane %v391_v50, 4  ;;  %v466_v63 = vmax.f32 %v385_v34, %v465_v35 }
  0xea   :  { %863 = vmatmul.f32.gmra.mxu1 %v2758_v23  ;;  %1237 = vmatmul.f32.gmra.mxu2 %v2912_v2  ;;  %v630_v23 = vmax.f32 %v628_v18, %v629_v10  ;;  %v575_v18 = vrot.slane %v574_v7, 2  ;;  %v473_v10 = vrot.slane %v472_v53, 2  ;;  %v604_v46 = vmax.f32 %v408_v40, %v603_v21 }
  0xeb   :  { %1266 = vmatmul.f32.gmra.mxu3 %v2837_v61  ;;  %1307 = vmatmul.f32.gmra.mxu0 %v2837_v61  ;;  %v284_v54 = vpop.f32.mrf.mxu2  ;;  %v581_v34 = vrot.slane %v580_v5, 2 }
  0xec   :  { %v409_v1 = vadd.f32 %v2828_v52, %v284_v54  ;;  %v313_v6 = vpop.f32.mrf.mxu3  ;;  %v631_v9 = vrot.slane %v630_v23, 1  ;;  %v576_v54 = vmax.f32 %v574_v7, %v575_v18  ;;  %v474_v56 = vmax.f32 %v472_v53, %v473_v10 }
  0xed   :  { %v390_v58 = vadd.f32 %v2891_v17, %v313_v6  ;;  %v246_v27 = vpop.f32.mrf.mxu1  ;;  %v502_v6 = vmax.f32 %v391_v50, %v501_v0  ;;  %v2950_v7 = vmax.f32 %v444_v41, %v445_v33  ;;  %v2952_v50 = vmax.f32 %v552_v12, %v553_v24 }
  0xee   :  { %v609_v25 = vrot.slane %v409_v1, 4  ;;  %v357_v20 = vpop.f32.mrf.mxu0  ;;  %v413_v32 = vadd.f32 %v2814_v43, %v246_v27  ;;  %v2942_v37 = vmax.f32 %v630_v23, %v631_v9  ;;  %v2944_v43 = vmax.f32 %v522_v51, %v523_v22 }
  0xef   :  { %v495_v3 = vrot.slane %v390_v58, 4  ;;  %v396_v44 = vadd.f32 %v2880_v15, %v357_v20  ;;  %v439_v27 = vrot.slane %v438_v39, 1  ;;  %3708 = vst [vmem:[#allocation27_spill] sm:$0xff] %v2950_v7  ;;  %v605_v23 = vrot.slane %v604_v46, 2 }
  0xf0   :  { %v610_v49 = vmax.f32 %v409_v1, %v609_v25  ;;  %3705 = vst [vmem:[#allocation31_spill] sm:$0xff] %v2942_v37  ;;  %v633_v35 = vrot.slane %v413_v32, 4  ;;  %v467_v1 = vrot.slane %v466_v63, 2  ;;  %v577_v51 = vrot.slane %v576_v54, 1 }
  0xf1   :  { %3706 = vst [vmem:[#allocation26_spill] sm:$0xff] %v2944_v43  ;;  %v496_v40 = vmax.f32 %v390_v58, %v495_v3  ;;  %v503_v0 = vrot.slane %v502_v6, 2  ;;  %v531_v25 = vrot.slane %v396_v44, 4  ;;  %v475_v20 = vrot.slane %v474_v56, 1 }
  0xf2   :  { %866 = vmatmul.f32.gmra.mxu1 %v2776_v26  ;;  %1240 = vmatmul.f32.gmra.mxu2 %v2932_v38  ;;  %v2946_v26 = vmax.f32 %v546_v47, %v547_v59  ;;  %3709 = vst [vmem:[#allocation33_spill] sm:$0xff] %v2952_v50  ;;  %v611_v47 = vrot.slane %v610_v49, 2  ;;  %v2957_v59 = vmax.f32 %v438_v39, %v439_v27 }
  0xf3   :  { %1269 = vmatmul.f32.gmra.mxu3 %v2855_v30  ;;  %1310 = vmatmul.f32.gmra.mxu0 %v2855_v30  ;;  %v287_v60 = vpop.f32.mrf.mxu2  ;;  %v582_v41 = vmax.f32 %v580_v5, %v581_v34  ;;  %v497_v12 = vrot.slane %v496_v40, 2  ;;  %v634_v10 = vmax.f32 %v413_v32, %v633_v35  ;;  %v468_v3 = vmax.f32 %v466_v63, %v467_v1 }
  0xf4   :  { %3707 = vst [vmem:[#allocation32_spill] sm:$0xff] %v2946_v26  ;;  %v316_v21 = vpop.f32.mrf.mxu3  ;;  %v414_v9 = vadd.f32 %v2828_v52, %v287_v60  ;;  %v606_v33 = vmax.f32 %v604_v46, %v605_v23  ;;  %v2964_v52 = vld [vmem:[#allocation8 + $0x30] sm:$0xff]  ;;  %v2966_v60 = vmax.f32 %v576_v54, %v577_v51  ;;  %v504_v39 = vmax.f32 %v502_v6, %v503_v0 }
  0xf5   :  { %v682_v18 = vpop.f32.mrf.mxu1  ;;  %v395_v58 = vadd.f32 %v2891_v17, %v316_v21  ;;  %3710 = vst [vmem:[#allocation28_spill] sm:$0xff] %v2957_v59  ;;  %v612_v5 = vmax.f32 %v610_v49, %v611_v47  ;;  %v532_v27 = vmax.f32 %v396_v44, %v531_v25  ;;  %v2968_v32 = vmax.f32 %v474_v56, %v475_v20 }
  0xf6   :  { %v360_v53 = vpop.f32.mrf.mxu0  ;;  %v875_v22 = vadd.f32 %v2948_v42, %v682_v18  ;;  %3711 = vst [vmem:[#allocation34_spill] sm:$0xff] %v2966_v60  ;;  %v639_v34 = vrot.slane %v414_v9, 4  ;;  %v583_v46 = vrot.slane %v582_v41, 1  ;;  %v498_v1 = vmax.f32 %v496_v40, %v497_v12 }
  0xf7   :  { %v401_v24 = vadd.f32 %v2880_v15, %v360_v53  ;;  %3712 = vst [vmem:[#allocation29_spill] sm:$0xff] %v2968_v32  ;;  %v525_v35 = vrot.slane %v395_v58, 4  ;;  %v635_v23 = vrot.slane %v634_v10, 2  ;;  %v469_v7 = vrot.slane %v468_v3, 1 }
  0xf8   :  { %v915_v21 = vrot.slane %v875_v22, 4  ;;  %v607_v26 = vrot.slane %v606_v33, 1  ;;  %v505_v49 = vrot.slane %v504_v39, 1  ;;  %v613_v44 = vrot.slane %v612_v5, 1 }
  0xf9   :  { %v561_v50 = vrot.slane %v401_v24, 4  ;;  %v533_v56 = vrot.slane %v532_v27, 2  ;;  %v640_v47 = vmax.f32 %v414_v9, %v639_v34  ;;  %v526_v25 = vmax.f32 %v395_v58, %v525_v35 }
  0xfa   :  { %1348 = vmatmul.f32.vlgmr.msrb.gmra.mxu1 %v2837_v61  ;;  %1383 = vmatmul.f32.vlgmr.msrb.gmra.mxu2 %v2794_v31  ;;  %v916_v20 = vmax.f32 %v875_v22, %v915_v21  ;;  %v2973_v12 = vmax.f32 %v582_v41, %v583_v46  ;;  %v499_v32 = vrot.slane %v498_v1, 1  ;;  %v2982_v9 = vmax.f32 %v606_v33, %v607_v26 }
  0xfb   :  { %1272 = vmatmul.f32.gmra.mxu3 %v2869_v55  ;;  %1313 = vmatmul.f32.gmra.mxu0 %v2869_v55  ;;  %v723_v63 = vpop.f32.mrf.mxu2  ;;  %v562_v43 = vmax.f32 %v401_v24, %v561_v50  ;;  %v2984_v58 = vmax.f32 %v504_v39, %v505_v49  ;;  %v534_v22 = vmax.f32 %v532_v27, %v533_v56  ;;  %v641_v34 = vrot.slane %v640_v47, 2 }
  0xfc   :  { %v319_v18 = vpop.f32.mrf.mxu3  ;;  %v876_v53 = vadd.f32 %v2964_v52, %v723_v63  ;;  %3713 = vst [vmem:[#allocation15_spill] sm:$0xff] %v2973_v12  ;;  %v636_v63 = vmax.f32 %v634_v10, %v635_v23  ;;  %v2986_v10 = vmax.f32 %v612_v5, %v613_v44  ;;  %v527_v35 = vrot.slane %v526_v25, 2 }
  0xfd   :  { %v400_v54 = vadd.f32 %v2891_v17, %v319_v18  ;;  %v685_v6 = vpop.f32.mrf.mxu1  ;;  %v2978_v18 = vmax.f32 %v468_v3, %v469_v7  ;;  %3715 = vst [vmem:[#allocation16_spill] sm:$0xff] %v2982_v9  ;;  %v917_v21 = vrot.slane %v916_v20, 2  ;;  %v2988_v3 = vmax.f32 %v498_v1, %v499_v32 }
  0xfe   :  { %v921_v51 = vrot.slane %v876_v53, 4  ;;  %v363_v0 = vpop.f32.mrf.mxu0  ;;  %v880_v40 = vadd.f32 %v2948_v42, %v685_v6  ;;  %3716 = vst [vmem:[#allocation36_spill] sm:$0xff] %v2984_v58  ;;  %v637_v50 = vrot.slane %v636_v63, 1  ;;  %v535_v6 = vrot.slane %v534_v22, 1 }
  0xff   :  { %v406_v60 = vadd.f32 %v2880_v15, %v363_v0  ;;  %3714 = vst [vmem:[#allocation35_spill] sm:$0xff] %v2978_v18  ;;  %v555_v37 = vrot.slane %v400_v54, 4  ;;  %v528_v32 = vmax.f32 %v526_v25, %v527_v35  ;;  %v918_v1 = vmax.f32 %v916_v20, %v917_v21 }
 0x100   :  { %v922_v11 = vmax.f32 %v876_v53, %v921_v51  ;;  %v945_v41 = vrot.slane %v880_v40, 4  ;;  %3717 = vst [vmem:[#allocation17_spill] sm:$0xff] %v2986_v10  ;;  %v563_v53 = vrot.slane %v562_v43, 2  ;;  %v642_v51 = vmax.f32 %v640_v47, %v641_v34 }
 0x101   :  { %3718 = vst [vmem:[#allocation18_spill] sm:$0xff] %v2988_v3  ;;  %v591_v24 = vrot.slane %v406_v60, 4  ;;  %v556_v26 = vmax.f32 %v400_v54, %v555_v37  ;;  %v2996_v37 = vmax.f32 %v636_v63, %v637_v50  ;;  %v3000_v34 = vmax.f32 %v534_v22, %v535_v6 }
 0x102   :  { %1351 = vmatmul.f32.gmra.mxu1 %v2855_v30  ;;  %1386 = vmatmul.f32.gmra.mxu2 %v2816_v45  ;;  %v923_v33 = vrot.slane %v922_v11, 2  ;;  %v946_v5 = vmax.f32 %v880_v40, %v945_v41  ;;  %v564_v54 = vmax.f32 %v562_v43, %v563_v53  ;;  %v643_v35 = vrot.slane %v642_v51, 1 }
 0x103   :  { %1275 = vmatmul.f32.gmra.mxu3 %v2893_v28  ;;  %1316 = vmatmul.f32.gmra.mxu0 %v2893_v28  ;;  %v726_v7 = vpop.f32.mrf.mxu2  ;;  %v592_v10 = vmax.f32 %v406_v60, %v591_v24  ;;  %3719 = vst [vmem:[#allocation38_spill] sm:$0xff] %v2996_v37  ;;  %v557_v40 = vrot.slane %v556_v26, 2  ;;  %v529_v21 = vrot.slane %v528_v32, 1 }
 0x104   :  { %v322_v46 = vpop.f32.mrf.mxu3  ;;  %v881_v23 = vadd.f32 %v2964_v52, %v726_v7  ;;  %v924_v41 = vmax.f32 %v922_v11, %v923_v33  ;;  %v947_v47 = vrot.slane %v946_v5, 2  ;;  %3720 = vst [vmem:[#allocation19_spill] sm:$0xff] %v3000_v34 }
 0x105   :  { %v405_v39 = vadd.f32 %v2891_v17, %v322_v46  ;;  %v593_v63 = vrot.slane %v592_v10, 2  ;;  %v558_v53 = vmax.f32 %v556_v26, %v557_v40 }
 0x106   :  { %v688_v27 = vpop.f32.mrf.mxu1  ;;  %v951_v49 = vrot.slane %v881_v23, 4 }
 0x107   :  { %v366_v44 = vpop.f32.mrf.mxu0  ;;  %v885_v56 = vadd.f32 %v2948_v42, %v688_v27  ;;  %v585_v0 = vrot.slane %v405_v39, 4 }
 0x108   :  { %v952_v58 = vmax.f32 %v881_v23, %v951_v49  ;;  %v411_v7 = vadd.f32 %v2880_v15, %v366_v44  ;;  %v565_v23 = vrot.slane %v564_v54, 1  ;;  %v925_v49 = vrot.slane %v924_v41, 1 }
 0x109   :  { %v975_v12 = vrot.slane %v885_v56, 4  ;;  %v586_v25 = vmax.f32 %v405_v39, %v585_v0 }
 0x10a   :  { %1354 = vmatmul.f32.gmra.mxu1 %v2869_v55  ;;  %1389 = vmatmul.f32.gmra.mxu2 %v2837_v61  ;;  %v621_v60 = vrot.slane %v411_v7, 4  ;;  %v953_v24 = vrot.slane %v952_v58, 2  ;;  %v919_v61 = vrot.slane %v918_v1, 1 }
 0x10b   :  { %1278 = vmatmul.f32.gmra.mxu3 %v2912_v2  ;;  %1319 = vmatmul.f32.gmra.mxu0 %v2912_v2  ;;  %v976_v20 = vmax.f32 %v885_v56, %v975_v12  ;;  %v948_v12 = vmax.f32 %v946_v5, %v947_v47  ;;  %v587_v22 = vrot.slane %v586_v25, 2 }
 0x10c   :  { %v729_v46 = vpop.f32.mrf.mxu2  ;;  %v622_v50 = vmax.f32 %v411_v7, %v621_v60  ;;  %v954_v56 = vmax.f32 %v952_v58, %v953_v24  ;;  %v3006_v60 = vmax.f32 %v918_v1, %v919_v61  ;;  %v559_v58 = vrot.slane %v558_v53, 1 }
 0x10d   :  { %v325_v43 = vpop.f32.mrf.mxu3  ;;  %v886_v11 = vadd.f32 %v2964_v52, %v729_v46  ;;  %v977_v33 = vrot.slane %v976_v20, 2  ;;  %v594_v46 = vmax.f32 %v592_v10, %v593_v63  ;;  %v3014_v1 = vmax.f32 %v924_v41, %v925_v49 }
 0x10e   :  { %v410_v27 = vadd.f32 %v2891_v17, %v325_v43  ;;  %v691_v39 = vpop.f32.mrf.mxu1  ;;  %v623_v37 = vrot.slane %v622_v50, 2  ;;  %v3016_v24 = vmax.f32 %v528_v32, %v529_v21  ;;  %v949_v61 = vrot.slane %v948_v12, 1 }
 0x10f   :  { %v981_v6 = vrot.slane %v886_v11, 4  ;;  %v369_v44 = vpop.f32.mrf.mxu0  ;;  %v890_v7 = vadd.f32 %v2948_v42, %v691_v39  ;;  %v978_v40 = vmax.f32 %v976_v20, %v977_v33  ;;  %v588_v63 = vmax.f32 %v586_v25, %v587_v22 }
 0x110   :  { %v615_v0 = vrot.slane %v410_v27, 4  ;;  %v416_v34 = vadd.f32 %v2880_v15, %v369_v44  ;;  %v3012_v15 = vmax.f32 %v642_v51, %v643_v35  ;;  %3721 = vst [vmem:[#allocation20_spill] sm:$0xff] %v3016_v24  ;;  %v3018_v20 = vmax.f32 %v564_v54, %v565_v23 }
 0x111   :  { %v982_v26 = vmax.f32 %v886_v11, %v981_v6  ;;  %v1005_v43 = vrot.slane %v890_v7, 4  ;;  %v955_v11 = vrot.slane %v954_v56, 1  ;;  %v595_v51 = vrot.slane %v594_v46, 1 }
 0x112   :  { %1357 = vmatmul.f32.gmra.mxu1 %v2893_v28  ;;  %1392 = vmatmul.f32.gmra.mxu2 %v2855_v30  ;;  %v616_v5 = vmax.f32 %v410_v27, %v615_v0  ;;  %v651_v47 = vrot.slane %v416_v34, 4  ;;  %3722 = vst [vmem:[#allocation22_spill] sm:$0xff] %v3018_v20  ;;  %v624_v35 = vmax.f32 %v622_v50, %v623_v37  ;;  %v979_v44 = vrot.slane %v978_v40, 1  ;;  %v3022_v0 = vld [vmem:[#allocation8 + $0x40] sm:$0xff] }
 0x113   :  { %1281 = vmatmul.f32.gmra.mxu3 %v2932_v38  ;;  %1322 = vmatmul.f32.gmra.mxu0 %v2932_v38  ;;  %v983_v10 = vrot.slane %v982_v26, 2  ;;  %v1006_v41 = vmax.f32 %v890_v7, %v1005_v43  ;;  %v3024_v32 = vmax.f32 %v558_v53, %v559_v58  ;;  %v3029_v22 = vmax.f32 %v948_v12, %v949_v61 }
 0x114   :  { %v732_v30 = vpop.f32.mrf.mxu2  ;;  %v617_v27 = vrot.slane %v616_v5, 2  ;;  %v652_v39 = vmax.f32 %v416_v34, %v651_v47  ;;  %v589_v34 = vrot.slane %v588_v63, 1  ;;  %v3031_v47 = vmax.f32 %v954_v56, %v955_v11 }
 0x115   :  { %v328_v6 = vpop.f32.mrf.mxu3  ;;  %3723 = vst [vmem:[#allocation23_spill] sm:$0xff] %v3024_v32  ;;  %v984_v54 = vmax.f32 %v982_v26, %v983_v10  ;;  %v891_v37 = vadd.f32 %v2964_v52, %v732_v30  ;;  %v3037_v26 = vmax.f32 %v594_v46, %v595_v51  ;;  %v625_v58 = vrot.slane %v624_v35, 1  ;;  %v3044_v30 = vld [vmem:[#allocation8 + $0x38] sm:$0xff] }
 0x116   :  { %v694_v49 = vpop.f32.mrf.mxu1  ;;  %v618_v50 = vmax.f32 %v616_v5, %v617_v27  ;;  %v653_v7 = vrot.slane %v652_v39, 2  ;;  %v3039_v10 = vmax.f32 %v978_v40, %v979_v44  ;;  %v1007_v12 = vrot.slane %v1006_v41, 2 }
 0x117   :  { %v895_v21 = vadd.f32 %v2948_v42, %v694_v49  ;;  %v805_v23 = vpop.f32.mrf.mxu0  ;;  %3724 = vst [vmem:[#allocation24_spill] sm:$0xff] %v3037_v26  ;;  %v985_v56 = vrot.slane %v984_v54, 1  ;;  %v415_v5 = vadd.f32 %v2891_v17, %v328_v6  ;;  %v3048_v46 = vmax.f32 %v588_v63, %v589_v34 }
 0x118   :  { %v878_v53 = vadd.f32 %v3022_v0, %v805_v23  ;;  %v1011_v27 = vrot.slane %v891_v37, 4  ;;  %v654_v44 = vmax.f32 %v652_v39, %v653_v7  ;;  %v3052_v17 = vmax.f32 %v624_v35, %v625_v58 }
 0x119   :  { %v1035_v43 = vrot.slane %v895_v21, 4  ;;  %3725 = vst [vmem:[#allocation39_spill] sm:$0xff] %v3048_v46  ;;  %v3057_v34 = vmax.f32 %v984_v54, %v985_v56  ;;  %v645_v25 = vrot.slane %v415_v5, 4 }
 0x11a   :  { %1360 = vmatmul.f32.gmra.mxu1 %v2912_v2  ;;  %1395 = vmatmul.f32.gmra.mxu2 %v2869_v55  ;;  %v933_v11 = vrot.slane %v878_v53, 4  ;;  %3726 = vst [vmem:[#allocation40_spill] sm:$0xff] %v3052_v17  ;;  %v1012_v26 = vmax.f32 %v891_v37, %v1011_v27  ;;  %v655_v58 = vrot.slane %v654_v44, 1 }
 0x11b   :  { %1342 = vmatmul.f32.vlgmr.msra.gmra.mxu0 %v2794_v31  ;;  %1401 = vmatmul.f32.vlgmr.msra.gmra.mxu3 %v2912_v2  ;;  %v1036_v61 = vmax.f32 %v895_v21, %v1035_v43  ;;  %v619_v31 = vrot.slane %v618_v50, 1  ;;  %v1008_v21 = vmax.f32 %v1006_v41, %v1007_v12  ;;  %3727 = vst [vmem:[#allocation41_spill] sm:$0xff] %v3057_v34 }
 0x11c   :  { %v735_v51 = vpop.f32.mrf.mxu2  ;;  %v934_v49 = vmax.f32 %v878_v53, %v933_v11  ;;  %v646_v37 = vmax.f32 %v415_v5, %v645_v25 }
 0x11d   :  { %v1037_v2 = vrot.slane %v1036_v61, 2  ;;  %v764_v23 = vpop.f32.mrf.mxu3  ;;  %v3061_v53 = vmax.f32 %v618_v50, %v619_v31  ;;  %v1009_v54 = vrot.slane %v1008_v21, 1  ;;  %v896_v50 = vadd.f32 %v2964_v52, %v735_v51 }
 0x11e   :  { %v877_v43 = vadd.f32 %v3044_v30, %v764_v23  ;;  %v697_v63 = vpop.f32.mrf.mxu1  ;;  %v935_v55 = vrot.slane %v934_v49, 2  ;;  %v3074_v23 = vmax.f32 %v654_v44, %v655_v58 }
 0x11f   :  { %v1038_v40 = vmax.f32 %v1036_v61, %v1037_v2  ;;  %v808_v33 = vpop.f32.mrf.mxu0  ;;  %v900_v7 = vadd.f32 %v2948_v42, %v697_v63  ;;  %3728 = vst [vmem:[#allocation42_spill] sm:$0xff] %v3061_v53 }
 0x120   :  { %v927_v39 = vrot.slane %v877_v43, 4  ;;  %v883_v35 = vadd.f32 %v3022_v0, %v808_v33  ;;  %v936_v41 = vmax.f32 %v934_v49, %v935_v55  ;;  %3729 = vst [vmem:[#allocation43_spill] sm:$0xff] %v3074_v23 }
 0x121   :  { %v1039_v11 = vrot.slane %v1038_v40, 1  ;;  %v1065_v56 = vrot.slane %v900_v7, 4 }
 0x122   :  { %1363 = vmatmul.f32.gmra.mxu1 %v2932_v38  ;;  %1398 = vmatmul.f32.gmra.mxu2 %v2893_v28  ;;  %v928_v12 = vmax.f32 %v877_v43, %v927_v39  ;;  %v963_v61 = vrot.slane %v883_v35, 4  ;;  %v937_v33 = vrot.slane %v936_v41, 1  ;;  %v1013_v43 = vrot.slane %v1012_v26, 2 }
 0x123   :  { %1345 = vmatmul.f32.gmra.mxu0 %v2816_v45  ;;  %1404 = vmatmul.f32.gmra.mxu3 %v2932_v38  ;;  %v3067_v27 = vmax.f32 %v1038_v40, %v1039_v11  ;;  %v1066_v2 = vmax.f32 %v900_v7, %v1065_v56  ;;  %v647_v11 = vrot.slane %v646_v37, 2 }
 0x124   :  { %v929_v31 = vrot.slane %v928_v12, 2  ;;  %v964_v28 = vmax.f32 %v883_v35, %v963_v61  ;;  %v3072_v49 = vpop.f32.mrf.mxu2  ;;  %v3078_v38 = vmax.f32 %v936_v41, %v937_v33  ;;  %v1041_v35 = vrot.slane %v896_v50, 4 }
 0x125   :  { %v767_v25 = vpop.f32.mrf.mxu3  ;;  %v1067_v40 = vrot.slane %v1066_v2, 2  ;;  %v3084_v33 = vmax.f32 %v1008_v21, %v1009_v54 }
 0x126   :  { %3730 = vst [vmem:[#allocation44_spill] sm:$0xff] %v3078_v38  ;;  %v930_v5 = vmax.f32 %v928_v12, %v929_v31  ;;  %v965_v51 = vrot.slane %v964_v28, 2  ;;  %v882_v63 = vadd.f32 %v3044_v30, %v767_v25  ;;  %v700_v39 = vpop.f32.mrf.mxu1  ;;  %v3086_v12 = vmax.f32 %v1012_v26, %v1013_v43 }
 0x127   :  { %v905_v44 = vadd.f32 %v2948_v42, %v700_v39  ;;  %v811_v58 = vpop.f32.mrf.mxu0  ;;  %v1068_v61 = vmax.f32 %v1066_v2, %v1067_v40  ;;  %v3091_v38 = vmax.f32 %v646_v37, %v647_v11  ;;  %v1042_v39 = vmax.f32 %v896_v50, %v1041_v35 }
 0x128   :  { %v931_v56 = vrot.slane %v930_v5, 1  ;;  %v966_v55 = vmax.f32 %v964_v28, %v965_v51  ;;  %v957_v41 = vrot.slane %v882_v63, 4  ;;  %v888_v25 = vadd.f32 %v3022_v0, %v811_v58 }
 0x129   :  { %v1095_v31 = vrot.slane %v905_v44, 4  ;;  %v1069_v6 = vrot.slane %v1068_v61, 1 }
 0x12a   :  { %v3089_v45 = vmax.f32 %v930_v5, %v931_v56  ;;  %v967_v23 = vrot.slane %v966_v55, 1  ;;  %v958_v7 = vmax.f32 %v882_v63, %v957_v41  ;;  %v993_v17 = vrot.slane %v888_v25, 4 }
 0x12b   :  { %v1096_v59 = vmax.f32 %v905_v44, %v1095_v31  ;;  %v3095_v21 = vmax.f32 %v1068_v61, %v1069_v6 }
 0x12c   :  { %v3097_v26 = vmax.f32 %v966_v55, %v967_v23  ;;  %v959_v54 = vrot.slane %v958_v7, 2  ;;  %v741_v28 = vpop.f32.mrf.mxu2  ;;  %v994_v40 = vmax.f32 %v888_v25, %v993_v17  ;;  %v1043_v23 = vrot.slane %v1042_v39, 2 }
 0x12d   :  { %v1097_v5 = vrot.slane %v1096_v59, 2  ;;  %v906_v51 = vadd.f32 %v2964_v52, %v741_v28  ;;  %v770_v37 = vpop.f32.mrf.mxu3 }
 0x12e   :  { %3731 = vst [vmem:[#allocation45_spill] sm:$0xff] %v3097_v26  ;;  %v960_v11 = vmax.f32 %v958_v7, %v959_v54  ;;  %v887_v6 = vadd.f32 %v3044_v30, %v770_v37  ;;  %v995_v44 = vrot.slane %v994_v40, 2 }
 0x12f   :  { %v703_v55 = vpop.f32.mrf.mxu1  ;;  %v1098_v35 = vmax.f32 %v1096_v59, %v1097_v5  ;;  %v1101_v58 = vrot.slane %v906_v51, 4  ;;  %v3111_v59 = vmax.f32 %v1042_v39, %v1043_v23 }
 0x130   :  { %v814_v56 = vpop.f32.mrf.mxu0  ;;  %v961_v61 = vrot.slane %v960_v11, 1  ;;  %v987_v17 = vrot.slane %v887_v6, 4  ;;  %v910_v41 = vadd.f32 %v2948_v42, %v703_v55  ;;  %v996_v50 = vmax.f32 %v994_v40, %v995_v44 }
 0x131   :  { %v893_v31 = vadd.f32 %v3022_v0, %v814_v56  ;;  %v1099_v28 = vrot.slane %v1098_v35, 1  ;;  %v1102_v63 = vmax.f32 %v906_v51, %v1101_v58 }
 0x132   :  { %v3109_v7 = vmax.f32 %v960_v11, %v961_v61  ;;  %v988_v54 = vmax.f32 %v887_v6, %v987_v17  ;;  %v1125_v37 = vrot.slane %v910_v41, 4  ;;  %v997_v43 = vrot.slane %v996_v50, 1  ;;  %v3123_v17 = vld [vmem:[#allocation8 + $0x48] sm:$0xff] }
 0x133   :  { %v1023_v2 = vrot.slane %v893_v31, 4  ;;  %v3113_v5 = vmax.f32 %v1098_v35, %v1099_v28  ;;  %v1103_v26 = vrot.slane %v1102_v63, 2 }
 0x134   :  { %v989_v55 = vrot.slane %v988_v54, 2  ;;  %v1126_v56 = vmax.f32 %v910_v41, %v1125_v37  ;;  %v3119_v51 = vmax.f32 %v996_v50, %v997_v43  ;;  %v3135_v41 = vld [vmem:[#allocation8 + $0x50] sm:$0xff] }
 0x135   :  { %3732 = vst [vmem:[#allocation46_spill] sm:$0xff] %v3113_v5  ;;  %v1024_v25 = vmax.f32 %v893_v31, %v1023_v2  ;;  %v744_v18 = vpop.f32.mrf.mxu2  ;;  %v1104_v11 = vmax.f32 %v1102_v63, %v1103_v26  ;;  %v901_v2 = vadd.f32 %v2964_v52, %v3072_v49  ;;  %v3743_v5 = vrot.slane %v3091_v38, 1 }
 0x136   :  { %3733 = vst [vmem:[#allocation47_spill] sm:$0xff] %v3119_v51  ;;  %v911_v39 = vadd.f32 %v2964_v52, %v744_v18  ;;  %v773_v6 = vpop.f32.mrf.mxu3  ;;  %v990_v23 = vmax.f32 %v988_v54, %v989_v55  ;;  %v1127_v35 = vrot.slane %v1126_v56, 2 }
 0x137   :  { %v1025_v44 = vrot.slane %v1024_v25, 2  ;;  %v892_v58 = vadd.f32 %v3044_v30, %v773_v6  ;;  %v846_v61 = vpop.f32.mrf.mxu1  ;;  %v1105_v43 = vrot.slane %v1104_v11, 1  ;;  %v1071_v51 = vrot.slane %v901_v2, 4 }
 0x138   :  { %v1131_v50 = vrot.slane %v911_v39, 4  ;;  %v817_v26 = vpop.f32.mrf.mxu0  ;;  %v991_v63 = vrot.slane %v990_v23, 1  ;;  %v1128_v18 = vmax.f32 %v1126_v56, %v1127_v35  ;;  %v879_v6 = vadd.f32 %v3123_v17, %v846_v61 }
 0x139   :  { %v1026_v31 = vmax.f32 %v1024_v25, %v1025_v44  ;;  %v1017_v28 = vrot.slane %v892_v58, 4  ;;  %v3129_v54 = vmax.f32 %v1104_v11, %v1105_v43  ;;  %v898_v55 = vadd.f32 %v3022_v0, %v817_v26  ;;  %v3735_v11 = vld [vmem:[#allocation21_spill] sm:$0xff] }
 0x13a   :  { %v1132_v37 = vmax.f32 %v911_v39, %v1131_v50  ;;  %v3133_v40 = vmax.f32 %v990_v23, %v991_v63  ;;  %v1129_v52 = vrot.slane %v1128_v18, 1 }
 0x13b   :  { %3734 = vst [vmem:[#allocation48_spill] sm:$0xff] %v3129_v54  ;;  %v1027_v49 = vrot.slane %v1026_v31, 1  ;;  %v1018_v42 = vmax.f32 %v892_v58, %v1017_v28  ;;  %v1053_v35 = vrot.slane %v898_v55, 4  ;;  %v939_v58 = vrot.slane %v879_v6, 4 }
 0x13c   :  { %v1133_v25 = vrot.slane %v1132_v37, 2  ;;  %v3141_v44 = vmax.f32 %v1128_v18, %v1129_v52  ;;  %v1045_v54 = vrot.slane %v3111_v59, 1 }
 0x13d   :  { %v3143_v43 = vmax.f32 %v1026_v31, %v1027_v49  ;;  %v1019_v23 = vrot.slane %v1018_v42, 2  ;;  %v1220_v61 = vpop.f32.mrf.mxu2  ;;  %v1054_v26 = vmax.f32 %v898_v55, %v1053_v35  ;;  %v1072_v31 = vmax.f32 %v901_v2, %v1071_v51 }
 0x13e   :  { %3736 = vst [vmem:[#allocation21_spill] sm:$0xff] %v3141_v44  ;;  %v1134_v50 = vmax.f32 %v1132_v37, %v1133_v25  ;;  %v776_v63 = vpop.f32.mrf.mxu3  ;;  %v1413_v28 = vadd.f32 %v3135_v41, %v1220_v61  ;;  %v3739_v55 = vrot.slane %v3086_v12, 1  ;;  %v940_v2 = vmax.f32 %v879_v6, %v939_v58 }
 0x13f   :  { %3737 = vst [vmem:[#allocation49_spill] sm:$0xff] %v3143_v43  ;;  %v1020_v9 = vmax.f32 %v1018_v42, %v1019_v23  ;;  %v897_v18 = vadd.f32 %v3044_v30, %v776_v63  ;;  %v849_v52 = vpop.f32.mrf.mxu1  ;;  %v1055_v39 = vrot.slane %v1054_v26, 2  ;;  %v1073_v44 = vrot.slane %v1072_v31, 2 }
 0x140   :  { %v1135_v49 = vrot.slane %v1134_v50, 1  ;;  %v1453_v34 = vrot.slane %v1413_v28, 4  ;;  %v820_v37 = vpop.f32.mrf.mxu0  ;;  %v3154_v25 = vmax.f32 %v3086_v12, %v3739_v55  ;;  %v3172_v6 = vmax.f32 %v3111_v59, %v1045_v54 }
 0x141   :  { %v1021_v35 = vrot.slane %v1020_v9, 1  ;;  %v1047_v61 = vrot.slane %v897_v18, 4  ;;  %v903_v56 = vadd.f32 %v3022_v0, %v820_v37  ;;  %v1056_v23 = vmax.f32 %v1054_v26, %v1055_v39 }
 0x142   :  { %v3158_v42 = vmax.f32 %v1134_v50, %v1135_v49  ;;  %v1454_v63 = vmax.f32 %v1413_v28, %v1453_v34  ;;  %v3167_v37 = vmax.f32 %v3091_v38, %v3743_v5  ;;  %v3745_v50 = vld [vmem:[#allocation26_spill] sm:$0xff] }
 0x143   :  { %v3160_v51 = vmax.f32 %v1020_v9, %v1021_v35  ;;  %v1048_v43 = vmax.f32 %v897_v18, %v1047_v61  ;;  %v1083_v24 = vrot.slane %v903_v56, 4  ;;  %v1057_v55 = vrot.slane %v1056_v23, 1 }
 0x144   :  { %3740 = vst [vmem:[#allocation50_spill] sm:$0xff] %v3158_v42  ;;  %v1455_v14 = vrot.slane %v1454_v63, 2  ;;  %v941_v35 = vrot.slane %v940_v2, 2  ;;  %v3178_v42 = vmax.f32 %v1072_v31, %v1073_v44  ;;  %v3189_v31 = vld [vmem:[#allocation7] sm:$0x1f] }
 0x145   :  { %3741 = vst [vmem:[#allocation51_spill] sm:$0xff] %v3160_v51  ;;  %v1049_v34 = vrot.slane %v1048_v43, 2  ;;  %v1084_v9 = vmax.f32 %v903_v56, %v1083_v24  ;;  %v1223_v26 = vpop.f32.mrf.mxu2  ;;  %v3174_v58 = vmax.f32 %v1056_v23, %v1057_v55 }
 0x146   :  { %3744 = vst [vmem:[#allocation52_spill] sm:$0xff] %v3167_v37  ;;  %v1456_v28 = vmax.f32 %v1454_v63, %v1455_v14  ;;  %v779_v18 = vpop.f32.mrf.mxu3  ;;  %v1418_v49 = vadd.f32 %v3135_v41, %v1223_v26  ;;  %v884_v14 = vadd.f32 %v3123_v17, %v849_v52 }
 0x147   :  { %3746 = vst [vmem:[#allocation26_spill] sm:$0xff] %v3174_v58  ;;  %v1050_v61 = vmax.f32 %v1048_v43, %v1049_v34  ;;  %v1085_v12 = vrot.slane %v1084_v9, 2  ;;  %v902_v38 = vadd.f32 %v3044_v30, %v779_v18  ;;  %v852_v5 = vpop.f32.mrf.mxu1  ;;  %v3185_v18 = vmax.f32 %v940_v2, %v941_v35 }
 0x148   :  { %v1457_v56 = vrot.slane %v1456_v28, 1  ;;  %v1483_v59 = vrot.slane %v1418_v49, 4  ;;  %v823_v54 = vpop.f32.mrf.mxu0  ;;  %v889_v34 = vadd.f32 %v3123_v17, %v852_v5  ;;  %v969_v2 = vrot.slane %v884_v14, 4 }
 0x149   :  { %v1051_v23 = vrot.slane %v1050_v61, 1  ;;  %v1086_v55 = vmax.f32 %v1084_v9, %v1085_v12  ;;  %v1077_v63 = vrot.slane %v902_v38, 4  ;;  %v908_v43 = vadd.f32 %v3022_v0, %v823_v54 }
 0x14a   :  { %v1458_v26 = vmax.f32 %v1456_v28, %v1457_v56  ;;  %v1484_v39 = vmax.f32 %v1418_v49, %v1483_v59  ;;  %v3748_v12 = vmax.f32 %v2872_v62, %v3006_v60  ;;  %v999_v28 = vrot.slane %v889_v34, 4 }
 0x14b   :  { %v3187_v44 = vmax.f32 %v1050_v61, %v1051_v23  ;;  %v1087_v24 = vrot.slane %v1086_v55, 1  ;;  %v1078_v58 = vmax.f32 %v902_v38, %v1077_v63  ;;  %v1113_v32 = vrot.slane %v908_v43, 4 }
 0x14c   :  { %v1693_v9 = vmax.f32 %v3748_v12, %v1458_v26  ;;  %v1485_v52 = vrot.slane %v1484_v39, 2  ;;  %v3199_v5 = vperm.slane %v3189_v31, 0  ;;  %v1000_v23 = vmax.f32 %v889_v34, %v999_v28 }
 0x14d   :  { %3747 = vst [vmem:[#allocation53_spill] sm:$0xff] %v3187_v44  ;;  %v3196_v59 = vmax.f32 %v1086_v55, %v1087_v24  ;;  %v1079_v35 = vrot.slane %v1078_v58, 2  ;;  %v1226_v61 = vpop.f32.mrf.mxu2  ;;  %v1114_v38 = vmax.f32 %v908_v43, %v1113_v32  ;;  %v970_v51 = vmax.f32 %v884_v14, %v969_v2 }
 0x14e   :  { %v1486_v54 = vmax.f32 %v1484_v39, %v1485_v52  ;;  %v782_v63 = vpop.f32.mrf.mxu3  ;;  %v1001_v44 = vrot.slane %v1000_v23, 2  ;;  %v1423_v43 = vadd.f32 %v3135_v41, %v1226_v61  ;;  %v1745_v34 = vadd.f32 %v3199_v5, %v1693_v9  ;;  %v3752_v61 = vld [vmem:[#allocation15_spill] sm:$0xff] }
 0x14f   :  { %3750 = vst [vmem:[#allocation54_spill] sm:$0xff] %v3196_v59  ;;  %v1080_v26 = vmax.f32 %v1078_v58, %v1079_v35  ;;  %v907_v12 = vadd.f32 %v3044_v30, %v782_v63  ;;  %v855_v24 = vpop.f32.mrf.mxu1  ;;  %v1115_v3 = vrot.slane %v1114_v38, 2  ;;  %v3751_v62 = vmax.f32 %v2895_v29, %v3029_v22 }
 0x150   :  { %v1487_v56 = vrot.slane %v1486_v54, 1  ;;  %v826_v49 = vpop.f32.mrf.mxu0  ;;  %v1002_v60 = vmax.f32 %v1000_v23, %v1001_v44  ;;  %v1513_v63 = vrot.slane %v1423_v43, 4  ;;  %v894_v46 = vadd.f32 %v3123_v17, %v855_v24 }
 0x151   :  { %v1081_v39 = vrot.slane %v1080_v26, 1  ;;  %v1107_v32 = vrot.slane %v907_v12, 4  ;;  %v1116_v28 = vmax.f32 %v1114_v38, %v1115_v3  ;;  %v913_v55 = vadd.f32 %v3022_v0, %v826_v49 }
 0x152   :  { %v1488_v52 = vmax.f32 %v1486_v54, %v1487_v56  ;;  %v1003_v2 = vrot.slane %v1002_v60, 1  ;;  %v1514_v3 = vmax.f32 %v1423_v43, %v1513_v63  ;;  %v1029_v29 = vrot.slane %v894_v46, 4 }
 0x153   :  { %v3208_v58 = vmax.f32 %v1080_v26, %v1081_v39  ;;  %v1108_v35 = vmax.f32 %v907_v12, %v1107_v32  ;;  %v1117_v14 = vrot.slane %v1116_v28, 1  ;;  %v1143_v44 = vrot.slane %v913_v55, 4 }
 0x154   :  { %v1698_v59 = vmax.f32 %v3751_v62, %v1488_v52  ;;  %v3220_v0 = vmax.f32 %v1002_v60, %v1003_v2  ;;  %v971_v49 = vrot.slane %v970_v51, 2  ;;  %v1515_v26 = vrot.slane %v1514_v3, 2  ;;  %v3227_v2 = vld [vmem:[#allocation8 + $0x60] sm:$0xff] }
 0x155   :  { %v1109_v56 = vrot.slane %v1108_v35, 2  ;;  %v1229_v54 = vpop.f32.mrf.mxu2  ;;  %v3218_v23 = vmax.f32 %v1116_v28, %v1117_v14  ;;  %v1144_v12 = vmax.f32 %v913_v55, %v1143_v44 }
 0x156   :  { %v1750_v38 = vadd.f32 %v3199_v5, %v1698_v59  ;;  %3754 = vst [vmem:[#allocation55_spill] sm:$0xff] %v3220_v0  ;;  %v785_v22 = vpop.f32.mrf.mxu3  ;;  %v1030_v59 = vmax.f32 %v894_v46, %v1029_v29  ;;  %v1516_v28 = vmax.f32 %v1514_v3, %v1515_v26  ;;  %v1428_v55 = vadd.f32 %v3135_v41, %v1229_v54 }
 0x157   :  { %3753 = vst [vmem:[#allocation15_spill] sm:$0xff] %v3218_v23  ;;  %v1110_v62 = vmax.f32 %v1108_v35, %v1109_v56  ;;  %v858_v24 = vpop.f32.mrf.mxu1  ;;  %v1145_v63 = vrot.slane %v1144_v12, 2  ;;  %v912_v60 = vadd.f32 %v3044_v30, %v785_v22  ;;  %v972_v44 = vmax.f32 %v970_v51, %v971_v49  ;;  %v3757_v30 = vld [vmem:[#allocation17_spill] sm:$0xff] }
 0x158   :  { %2028 = vtanh.f32 %v1750_v38  ;;  %v1302_v14 = vpop.f32.mrf.mxu0  ;;  %v1031_v35 = vrot.slane %v1030_v59, 2  ;;  %v899_v56 = vadd.f32 %v3123_v17, %v858_v24  ;;  %v1517_v39 = vrot.slane %v1516_v28, 1 }
 0x159   :  { %v1111_v52 = vrot.slane %v1110_v62, 1  ;;  %2030 = vtanh.f32 %v1745_v34  ;;  %v1146_v43 = vmax.f32 %v1144_v12, %v1145_v63  ;;  %v1543_v29 = vrot.slane %v1428_v55, 4 }
 0x15a   :  { %v1032_v46 = vmax.f32 %v1030_v59, %v1031_v35  ;;  %v1059_v3 = vrot.slane %v899_v56, 4  ;;  %v1415_v26 = vadd.f32 %v3227_v2, %v1302_v14  ;;  %v1518_v9 = vmax.f32 %v1516_v28, %v1517_v39 }
 0x15b   :  { %v3231_v38 = vmax.f32 %v1110_v62, %v1111_v52  ;;  %v1147_v34 = vrot.slane %v1146_v43, 1  ;;  %v1137_v23 = vrot.slane %v912_v60, 4  ;;  %v1544_v24 = vmax.f32 %v1428_v55, %v1543_v29 }
 0x15c   :  { %v1033_v0 = vrot.slane %v1032_v46, 1  ;;  %v1060_v51 = vmax.f32 %v899_v56, %v1059_v3  ;;  %v1465_v49 = vrot.slane %v1415_v26, 4  ;;  %v973_v62 = vrot.slane %v972_v44, 1 }
 0x15d   :  { %3756 = vst [vmem:[#allocation56_spill] sm:$0xff] %v3231_v38  ;;  %v1232_v53 = vpop.f32.mrf.mxu2  ;;  %v3758_v12 = vmax.f32 %v2910_v57, %v3039_v10  ;;  %v3239_v63 = vmax.f32 %v1146_v43, %v1147_v34  ;;  %v1545_v39 = vrot.slane %v1544_v24, 2  ;;  %v1138_v29 = vmax.f32 %v912_v60, %v1137_v23  ;;  %v3764_v23 = vld [vmem:[#allocation32_spill] sm:$0xff] }
 0x15e   :  { %v2029_v54 = vpop.eup %2028  ;;  %v3241_v35 = vmax.f32 %v1032_v46, %v1033_v0  ;;  %v1061_v28 = vrot.slane %v1060_v51, 2  ;;  %v1466_v22 = vmax.f32 %v1415_v26, %v1465_v49  ;;  %v1261_v3 = vpop.f32.mrf.mxu3  ;;  %v3249_v0 = vld [vmem:[#allocation8 + $0x58] sm:$0xff]  ;;  %v3762_v46 = vld [vmem:[#allocation25_spill] sm:$0xff]  ;;  %v3269_v56 = vmax.f32 %v972_v44, %v973_v62 }
 0x15f   :  { %v1865_v52 = vrot.slane %v2029_v54, 7  ;;  %v1703_v59 = vmax.f32 %v3758_v12, %v1518_v9  ;;  %3759 = vst [vmem:[#allocation17_spill] sm:$0xff] %v3239_v63  ;;  %v2031_v14 = vpop.eup %2030  ;;  %v1546_v9 = vmax.f32 %v1544_v24, %v1545_v39  ;;  %v1170_v26 = vmax.f32 %v3762_v46, %v3084_v33  ;;  %v3763_v54 = vld [vmem:[#allocation37_spill] sm:$0xff] }
 0x160   :  { %3760 = vst [vmem:[#allocation57_spill] sm:$0xff] %v3241_v35  ;;  %v1062_v43 = vmax.f32 %v1060_v51, %v1061_v28  ;;  %v1467_v34 = vrot.slane %v1466_v22, 2  ;;  %v1305_v12 = vpop.f32.mrf.mxu0  ;;  %v3765_v51 = vrot.slane %v3178_v42, 1  ;;  %v3766_v33 = vrot.slane %v3185_v18, 1 }
 0x161   :  { %v1867_v32 = vsel %vm1866_vm0, %v1865_v52, %v2031_v14  ;;  %v1755_v55 = vadd.f32 %v3199_v5, %v1703_v59  ;;  %v1433_v52 = vadd.f32 %v3135_v41, %v1232_v53  ;;  %v1547_v59 = vrot.slane %v1546_v9, 1 }
 0x162   :  { %v1063_v14 = vrot.slane %v1062_v43, 1  ;;  %v1468_v24 = vmax.f32 %v1466_v22, %v1467_v34  ;;  %v3261_v39 = vmax.f32 %v3178_v42, %v3765_v51  ;;  %v3266_v28 = vmax.f32 %v3185_v18, %v3766_v33  ;;  %v861_v22 = vpop.f32.mrf.mxu1 }
 0x163   :  { %2032 = vtanh.f32 %v1755_v55  ;;  %v1573_v55 = vrot.slane %v1433_v52, 4  ;;  %v1414_v53 = vadd.f32 %v3249_v0, %v1261_v3  ;;  %v1139_v10 = vrot.slane %v1138_v29, 2 }
 0x164   :  { %v1548_v60 = vmax.f32 %v1546_v9, %v1547_v59  ;;  %v3271_v49 = vmax.f32 %v1062_v43, %v1063_v14  ;;  %v1420_v42 = vadd.f32 %v3227_v2, %v1305_v12  ;;  %v1469_v3 = vrot.slane %v1468_v24, 1 }
 0x165   :  { %v1235_v46 = vpop.f32.mrf.mxu2  ;;  %v1574_v34 = vmax.f32 %v1433_v52, %v1573_v55  ;;  %v1459_v63 = vrot.slane %v1414_v53, 4  ;;  %v1140_v59 = vmax.f32 %v1138_v29, %v1139_v10  ;;  %v904_v14 = vadd.f32 %v3123_v17, %v861_v22 }
 0x166   :  { %3767 = vst [vmem:[#allocation25_spill] sm:$0xff] %v3271_v49  ;;  %v1438_v51 = vadd.f32 %v3135_v41, %v1235_v46  ;;  %v1708_v18 = vmax.f32 %v1170_v26, %v1548_v60  ;;  %v1495_v35 = vrot.slane %v1420_v42, 4  ;;  %v1264_v26 = vpop.f32.mrf.mxu3  ;;  %v3768_v60 = vld [vmem:[#allocation34_spill] sm:$0xff] }
 0x167   :  { %v1575_v44 = vrot.slane %v1574_v34, 2  ;;  %v1460_v62 = vmax.f32 %v1414_v53, %v1459_v63  ;;  %v1470_v63 = vmax.f32 %v1468_v24, %v1469_v3  ;;  %v3771_v24 = vmax.f32 %v2887_v4, %v3089_v45 }
 0x168   :  { %v1603_v9 = vrot.slane %v1438_v51, 4  ;;  %v1760_v52 = vadd.f32 %v3199_v5, %v1708_v18  ;;  %v1496_v46 = vmax.f32 %v1420_v42, %v1495_v35  ;;  %v1308_v10 = vpop.f32.mrf.mxu0  ;;  %v3769_v18 = vld [vmem:[#allocation27_spill] sm:$0xff]  ;;  %v1141_v42 = vrot.slane %v1140_v59, 1 }
 0x169   :  { %v2033_v37 = vpop.eup %2032  ;;  %v1576_v12 = vmax.f32 %v1574_v34, %v1575_v44  ;;  %v1461_v55 = vrot.slane %v1460_v62, 2  ;;  %v3770_v34 = vld [vmem:[#allocation29_spill] sm:$0xff]  ;;  %v1695_v3 = vmax.f32 %v3771_v24, %v1470_v63  ;;  %v3772_v35 = vmax.f32 %v2878_v19, %v3067_v27 }
 0x16a   :  { %v1868_v43 = vrot.slane %v2033_v37, 6  ;;  %v1604_v57 = vmax.f32 %v1438_v51, %v1603_v9  ;;  %2034 = vtanh.f32 %v1760_v52  ;;  %v1497_v37 = vrot.slane %v1496_v46, 2  ;;  %v864_v52 = vpop.f32.mrf.mxu1 }
 0x16b   :  { %v1577_v53 = vrot.slane %v1576_v12, 1  ;;  %v1462_v20 = vmax.f32 %v1460_v62, %v1461_v55  ;;  %v1419_v51 = vadd.f32 %v3249_v0, %v1264_v26  ;;  %v1089_v9 = vrot.slane %v904_v14, 4 }
 0x16c   :  { %v1870_v49 = vsel %vm1869_vm1, %v1868_v43, %v1867_v32  ;;  %v1605_v29 = vrot.slane %v1604_v57, 2  ;;  %v1498_v33 = vmax.f32 %v1496_v46, %v1497_v37  ;;  %v3291_v62 = vperm.slane %v3189_v31, 2 }
 0x16d   :  { %v1578_v44 = vmax.f32 %v1576_v12, %v1577_v53  ;;  %v1489_v43 = vrot.slane %v1419_v51, 4  ;;  %v1425_v55 = vadd.f32 %v3227_v2, %v1308_v10  ;;  %v1463_v26 = vrot.slane %v1462_v20, 1  ;;  %v1238_v38 = vpop.f32.mrf.mxu2 }
 0x16e   :  { %v1606_v32 = vmax.f32 %v1604_v57, %v1605_v29  ;;  %v1499_v12 = vrot.slane %v1498_v33, 1  ;;  %v3297_v57 = vmax.f32 %v1140_v59, %v1141_v42  ;;  %v1090_v29 = vmax.f32 %v904_v14, %v1089_v9 }
 0x16f   :  { %v1713_v22 = vmax.f32 %v3772_v35, %v1578_v44  ;;  %v1490_v4 = vmax.f32 %v1419_v51, %v1489_v43  ;;  %v1525_v45 = vrot.slane %v1425_v55, 4  ;;  %v1747_v10 = vadd.f32 %v3291_v62, %v1695_v3  ;;  %v1267_v3 = vpop.f32.mrf.mxu3 }
 0x170   :  { %v1607_v53 = vrot.slane %v1606_v32, 1  ;;  %v2035_v46 = vpop.eup %2034  ;;  %v1500_v24 = vmax.f32 %v1498_v33, %v1499_v12  ;;  %v1464_v44 = vmax.f32 %v1462_v20, %v1463_v26  ;;  %v3773_v59 = vmax.f32 %v2908_v48, %v3109_v7  ;;  %v1311_v12 = vpop.f32.mrf.mxu0 }
 0x171   :  { %v1871_v63 = vrot.slane %v2035_v46, 5  ;;  %v1765_v37 = vadd.f32 %v3199_v5, %v1713_v22  ;;  %v1491_v27 = vrot.slane %v1490_v4, 2  ;;  %v3306_v51 = vperm.slane %v3189_v31, 1 }
 0x172   :  { %v1608_v19 = vmax.f32 %v1606_v32, %v1607_v53  ;;  %v1700_v42 = vmax.f32 %v3773_v59, %v1500_v24  ;;  %v3774_v33 = vmax.f32 %v2906_v16, %v3095_v21  ;;  %v1526_v9 = vmax.f32 %v1425_v55, %v1525_v45 }
 0x173   :  { %v1873_v35 = vsel %vm1872_vm2, %v1871_v63, %v1870_v49  ;;  %2036 = vtanh.f32 %v1765_v37  ;;  %v1492_v22 = vmax.f32 %v1490_v4, %v1491_v27  ;;  %v1091_v32 = vrot.slane %v1090_v29, 2  ;;  %v867_v4 = vpop.f32.mrf.mxu1 }
 0x174   :  { %v1718_v14 = vmax.f32 %v3774_v33, %v1608_v19  ;;  %v1752_v43 = vadd.f32 %v3291_v62, %v1700_v42  ;;  %v909_v49 = vadd.f32 %v3123_v17, %v864_v52  ;;  %v1443_v20 = vadd.f32 %v3135_v41, %v1238_v38 }
 0x175   :  { %2038 = vtanh.f32 %v1747_v10  ;;  %v1493_v7 = vrot.slane %v1492_v22, 1  ;;  %v1527_v26 = vrot.slane %v1526_v9, 2  ;;  %v3775_v16 = vmax.f32 %v2874_v13, %v3014_v1 }
 0x176   :  { %v1770_v48 = vadd.f32 %v3199_v5, %v1718_v14  ;;  %2040 = vtanh.f32 %v1752_v43  ;;  %v1633_v55 = vrot.slane %v1443_v20, 4  ;;  %v1424_v53 = vadd.f32 %v3249_v0, %v1267_v3 }
 0x177   :  { %v1694_v21 = vmax.f32 %v3775_v16, %v1464_v44  ;;  %v1192_v46 = vmax.f32 %v3012_v15, %v3297_v57  ;;  %v1494_v52 = vmax.f32 %v1492_v22, %v1493_v7  ;;  %v1528_v38 = vmax.f32 %v1526_v9, %v1527_v26  ;;  %v1241_v22 = vpop.f32.mrf.mxu2  ;;  %v3811_v15 = vld [vmem:[#allocation49_spill] sm:$0xff] }
 0x178   :  { %2042 = vtanh.f32 %v1770_v48  ;;  %v1119_v63 = vrot.slane %v909_v49, 4  ;;  %v1634_v37 = vmax.f32 %v1443_v20, %v1633_v55  ;;  %v1519_v24 = vrot.slane %v1424_v53, 4  ;;  %v1270_v55 = vpop.f32.mrf.mxu3 }
 0x179   :  { %v2037_v45 = vpop.eup %2036  ;;  %v1430_v10 = vadd.f32 %v3227_v2, %v1311_v12  ;;  %v1092_v13 = vmax.f32 %v1090_v29, %v1091_v32  ;;  %v3776_v1 = vmax.f32 %v2897_v8, %v3031_v47  ;;  %v1529_v44 = vrot.slane %v1528_v38, 1 }
 0x17a   :  { %v1874_v19 = vrot.slane %v2037_v45, 4  ;;  %v1746_v59 = vadd.f32 %v3306_v51, %v1694_v21  ;;  %v1635_v42 = vrot.slane %v1634_v37, 2  ;;  %v1520_v33 = vmax.f32 %v1424_v53, %v1519_v24 }
 0x17b   :  { %v1699_v27 = vmax.f32 %v3776_v1, %v1494_v52  ;;  %v1555_v14 = vrot.slane %v1430_v10, 4  ;;  %v2039_v9 = vpop.eup %2038  ;;  %v1530_v20 = vmax.f32 %v1528_v38, %v1529_v44  ;;  %v1120_v29 = vmax.f32 %v909_v49, %v1119_v63  ;;  %v3338_v44 = vld [vmem:[#allocation8 + $0x68] sm:$0xff] }
 0x17c   :  { %v1876_v3 = vsel %vm1875_vm3, %v1874_v19, %v1873_v35  ;;  %v2041_v48 = vpop.eup %2040  ;;  %v1636_v32 = vmax.f32 %v1634_v37, %v1635_v42  ;;  %v1521_v7 = vrot.slane %v1520_v33, 2  ;;  %v3777_v12 = vmax.f32 %v3735_v11, %v3133_v40  ;;  %v1314_v37 = vpop.f32.mrf.mxu0 }
 0x17d   :  { %v1751_v43 = vadd.f32 %v3306_v51, %v1699_v27  ;;  %v1556_v8 = vmax.f32 %v1430_v10, %v1555_v14  ;;  %v1900_v26 = vrot.slane %v2041_v48, 7  ;;  %v1448_v21 = vadd.f32 %v3135_v41, %v1241_v22  ;;  %v1349_v27 = vpop.f32.mrf.mxu1 }
 0x17e   :  { %v2043_v47 = vpop.eup %2042  ;;  %v1705_v16 = vmax.f32 %v3777_v12, %v1530_v20  ;;  %v1637_v53 = vrot.slane %v1636_v32, 1  ;;  %v1522_v52 = vmax.f32 %v1520_v33, %v1521_v7  ;;  %v1093_v24 = vrot.slane %v1092_v13, 1  ;;  %v3781_v12 = vld [vmem:[#allocation41_spill] sm:$0xff] }
 0x17f   :  { %2044 = vtanh.f32 %v1751_v43  ;;  %v1877_v35 = vrot.slane %v2043_v47, 3  ;;  %v1901_v38 = vsel %vm1866_vm0, %v1900_v26, %v2039_v9  ;;  %v1557_v45 = vrot.slane %v1556_v8, 2  ;;  %v3780_v26 = vld [vmem:[#allocation30_spill] sm:$0xff] }
 0x180   :  { %2046 = vtanh.f32 %v1746_v59  ;;  %v1757_v49 = vadd.f32 %v3291_v62, %v1705_v16  ;;  %v1663_v63 = vrot.slane %v1448_v21, 4  ;;  %v1638_v40 = vmax.f32 %v1636_v32, %v1637_v53  ;;  %v3778_v59 = vld [vmem:[#allocation46_spill] sm:$0xff] }
 0x181   :  { %v3335_v10 = vsel %vm1878_vm4, %v1877_v35, %v1876_v3  ;;  %v1523_v11 = vrot.slane %v1522_v52, 1  ;;  %v1558_v41 = vmax.f32 %v1556_v8, %v1557_v45  ;;  %v1429_v1 = vadd.f32 %v3249_v0, %v1270_v55 }
 0x182   :  { %2048 = vtanh.f32 %v1757_v49  ;;  %v1664_v19 = vmax.f32 %v1448_v21, %v1663_v63  ;;  %v3779_v42 = vmax.f32 %v2916_v36, %v3778_v59  ;;  %v914_v22 = vadd.f32 %v3123_v17, %v867_v4 }
 0x183   :  { %v1524_v14 = vmax.f32 %v1522_v52, %v1523_v11  ;;  %v1435_v9 = vadd.f32 %v3227_v2, %v1314_v37  ;;  %v1121_v43 = vrot.slane %v1120_v29, 2  ;;  %v1559_v20 = vrot.slane %v1558_v41, 1  ;;  %v3783_v37 = vld [vmem:[#allocation51_spill] sm:$0xff] }
 0x184   :  { %v1723_v33 = vmax.f32 %v3779_v42, %v1638_v40  ;;  %v1665_v48 = vrot.slane %v1664_v19, 2  ;;  %v1549_v32 = vrot.slane %v1429_v1, 4  ;;  %v3782_v16 = vmax.f32 %v3780_v26, %v3781_v12 }
 0x185   :  { %v2045_v3 = vpop.eup %2044  ;;  %v1426_v36 = vadd.f32 %v3338_v44, %v1349_v27  ;;  %v3350_v55 = vmax.f32 %v1092_v13, %v1093_v24  ;;  %v1560_v17 = vmax.f32 %v1558_v41, %v1559_v20  ;;  %v1585_v35 = vrot.slane %v1435_v9, 4  ;;  %v1273_v27 = vpop.f32.mrf.mxu3  ;;  %v3357_v24 = vld [vmem:[#allocation8 + $0x70] sm:$0xff] }
 0x186   :  { %v2047_v7 = vpop.eup %2046  ;;  %v1886_v8 = vrot.slane %v2045_v3, 7  ;;  %v1775_v47 = vadd.f32 %v3199_v5, %v1723_v33  ;;  %v1704_v21 = vmax.f32 %v3782_v16, %v1524_v14  ;;  %v1550_v4 = vmax.f32 %v1429_v1, %v1549_v32  ;;  %v1384_v13 = vpop.f32.mrf.mxu2 }
 0x187   :  { %v1149_v49 = vrot.slane %v914_v22, 4  ;;  %v1122_v63 = vmax.f32 %v1120_v29, %v1121_v43  ;;  %v3784_v40 = vmax.f32 %v3745_v50, %v3783_v37  ;;  %v1586_v42 = vmax.f32 %v1435_v9, %v1585_v35 }
 0x188   :  { %v1887_v53 = vsel %vm1866_vm0, %v1886_v8, %v2047_v7  ;;  %2050 = vtanh.f32 %v1775_v47  ;;  %v1756_v52 = vadd.f32 %v3306_v51, %v1704_v21  ;;  %v2049_v45 = vpop.eup %2048  ;;  %v1551_v59 = vrot.slane %v1550_v4, 2  ;;  %v1317_v47 = vpop.f32.mrf.mxu0  ;;  %v3785_v21 = vld [vmem:[#allocation24_spill] sm:$0xff] }
 0x189   :  { %v1710_v11 = vmax.f32 %v3784_v40, %v1560_v17  ;;  %v1902_v41 = vrot.slane %v2049_v45, 6  ;;  %v1666_v1 = vmax.f32 %v1664_v19, %v1665_v48  ;;  %v1531_v33 = vrot.slane %v1426_v36, 4  ;;  %v1352_v40 = vpop.f32.mrf.mxu1 }
 0x18a   :  { %2052 = vtanh.f32 %v1756_v52  ;;  %v1552_v3 = vmax.f32 %v1550_v4, %v1551_v59  ;;  %v1587_v20 = vrot.slane %v1586_v42, 2  ;;  %v1150_v43 = vmax.f32 %v914_v22, %v1149_v49 }
 0x18b   :  { %v1762_v14 = vadd.f32 %v3291_v62, %v1710_v11  ;;  %v1903_v29 = vsel %vm1869_vm1, %v1902_v41, %v1901_v38  ;;  %v1434_v50 = vadd.f32 %v3249_v0, %v1273_v27  ;;  %v1417_v9 = vadd.f32 %v3357_v24, %v1384_v13 }
 0x18c   :  { %v1123_v32 = vrot.slane %v1122_v63, 1  ;;  %v1553_v7 = vrot.slane %v1552_v3, 1  ;;  %v1588_v8 = vmax.f32 %v1586_v42, %v1587_v20  ;;  %v1667_v19 = vrot.slane %v1666_v1, 1 }
 0x18d   :  { %2054 = vtanh.f32 %v1762_v14  ;;  %v1532_v48 = vmax.f32 %v1426_v36, %v1531_v33  ;;  %v1579_v12 = vrot.slane %v1434_v50, 4  ;;  %v1477_v16 = vrot.slane %v1417_v9, 4 }
 0x18e   :  { %v2051_v26 = vpop.eup %2050  ;;  %v1184_v17 = vmax.f32 %v3785_v21, %v3350_v55  ;;  %v1554_v38 = vmax.f32 %v1552_v3, %v1553_v7  ;;  %v1589_v22 = vrot.slane %v1588_v8, 1  ;;  %v1151_v52 = vrot.slane %v1150_v43, 2  ;;  %v3787_v7 = vld [vmem:[#allocation33_spill] sm:$0xff] }
 0x18f   :  { %v1880_v4 = vrot.slane %v2051_v26, 2  ;;  %v1580_v49 = vmax.f32 %v1434_v50, %v1579_v12  ;;  %v1478_v45 = vmax.f32 %v1417_v9, %v1477_v16  ;;  %v1440_v37 = vadd.f32 %v3227_v2, %v1317_v47  ;;  %v3788_v47 = vld [vmem:[#allocation53_spill] sm:$0xff]  ;;  %v1387_v16 = vpop.f32.mrf.mxu2 }
 0x190   :  { %v2053_v35 = vpop.eup %2052  ;;  %v3366_v11 = vmax.f32 %v1122_v63, %v1123_v32  ;;  %v3786_v42 = vmax.f32 %v3763_v54, %v3154_v25  ;;  %v1668_v13 = vmax.f32 %v1666_v1, %v1667_v19  ;;  %v1590_v41 = vmax.f32 %v1588_v8, %v1589_v22  ;;  %v1276_v54 = vpop.f32.mrf.mxu3  ;;  %v3790_v1 = vld [vmem:[#allocation40_spill] sm:$0xff] }
 0x191   :  { %v3370_v36 = vsel %vm1881_vm5, %v1880_v4, %v3335_v10  ;;  %v1888_v59 = vrot.slane %v2053_v35, 6  ;;  %v1533_v33 = vrot.slane %v1532_v48, 2  ;;  %v1581_v14 = vrot.slane %v1580_v49, 2 }
 0x192   :  { %v1709_v27 = vmax.f32 %v3786_v42, %v1554_v38  ;;  %v1479_v63 = vrot.slane %v1478_v45, 2  ;;  %v1615_v9 = vrot.slane %v1440_v37, 4  ;;  %v3377_v32 = vmax.f32 %v1150_v43, %v1151_v52  ;;  %v3791_v38 = vld [vmem:[#allocation31_spill] sm:$0xff]  ;;  %v3792_v43 = vld [vmem:[#allocation21_spill] sm:$0xff] }
 0x193   :  { %v2055_v3 = vpop.eup %2054  ;;  %v1889_v20 = vsel %vm1869_vm1, %v1888_v59, %v1887_v53  ;;  %v3789_v26 = vmax.f32 %v3787_v7, %v3788_v47  ;;  %v1582_v25 = vmax.f32 %v1580_v49, %v1581_v14  ;;  %v1189_v8 = vmax.f32 %v3790_v1, %v3366_v11  ;;  %v1320_v14 = vpop.f32.mrf.mxu0 }
 0x194   :  { %v1761_v50 = vadd.f32 %v3306_v51, %v1709_v27  ;;  %v1904_v10 = vrot.slane %v2055_v3, 5  ;;  %v1616_v19 = vmax.f32 %v1440_v37, %v1615_v9  ;;  %v1431_v53 = vadd.f32 %v3338_v44, %v1352_v40  ;;  %v1355_v7 = vpop.f32.mrf.mxu1 }
 0x195   :  { %v1715_v12 = vmax.f32 %v3789_v26, %v1590_v41  ;;  %v3793_v22 = vmax.f32 %v3791_v38, %v3792_v43  ;;  %v1583_v59 = vrot.slane %v1582_v25, 1  ;;  %v1534_v42 = vmax.f32 %v1532_v48, %v1533_v33 }
 0x196   :  { %2056 = vtanh.f32 %v1761_v50  ;;  %v1905_v4 = vsel %vm1872_vm2, %v1904_v10, %v1903_v29  ;;  %v1480_v49 = vmax.f32 %v1478_v45, %v1479_v63  ;;  %v1617_v27 = vrot.slane %v1616_v19, 2 }
 0x197   :  { %v1728_v35 = vmax.f32 %v3793_v22, %v1668_v13  ;;  %v1767_v52 = vadd.f32 %v3291_v62, %v1715_v12  ;;  %v1439_v41 = vadd.f32 %v3249_v0, %v1276_v54  ;;  %v1153_v37 = vrot.slane %v3377_v32, 1 }
 0x198   :  { %v1584_v40 = vmax.f32 %v1582_v25, %v1583_v59  ;;  %v1422_v3 = vadd.f32 %v3357_v24, %v1387_v16  ;;  %v3394_v29 = vperm.slane %v3189_v31, 3  ;;  %v3397_v13 = vperm.slane %v3189_v31, 4 }
 0x199   :  { %2058 = vtanh.f32 %v1767_v52  ;;  %v1618_v50 = vmax.f32 %v1616_v19, %v1617_v27  ;;  %v1561_v9 = vrot.slane %v1431_v53, 4  ;;  %v3794_v48 = vmax.f32 %v3764_v23, %v3172_v6 }
 0x19a   :  { %v1609_v33 = vrot.slane %v1439_v41, 4  ;;  %v1507_v63 = vrot.slane %v1422_v3, 4  ;;  %v1445_v10 = vadd.f32 %v3227_v2, %v1320_v14  ;;  %v1780_v26 = vadd.f32 %v3199_v5, %v1728_v35 }
 0x19b   :  { %v1714_v45 = vmax.f32 %v3794_v48, %v1584_v40  ;;  %v1535_v12 = vrot.slane %v1534_v42, 1  ;;  %v1481_v25 = vrot.slane %v1480_v49, 1  ;;  %v1619_v54 = vrot.slane %v1618_v50, 1 }
 0x19c   :  { %v2057_v47 = vpop.eup %2056  ;;  %v1610_v19 = vmax.f32 %v1439_v41, %v1609_v33  ;;  %v1508_v38 = vmax.f32 %v1422_v3, %v1507_v63  ;;  %v1562_v22 = vmax.f32 %v1431_v53, %v1561_v9  ;;  %v1645_v6 = vrot.slane %v1445_v10, 4  ;;  %v1279_v41 = vpop.f32.mrf.mxu3 }
 0x19d   :  { %v1890_v16 = vrot.slane %v2057_v47, 5  ;;  %v1766_v31 = vadd.f32 %v3306_v51, %v1714_v45  ;;  %v1620_v43 = vmax.f32 %v1618_v50, %v1619_v54  ;;  %v1436_v23 = vadd.f32 %v3338_v44, %v1355_v7  ;;  %v1390_v45 = vpop.f32.mrf.mxu2 }
 0x19e   :  { %v1611_v27 = vrot.slane %v1610_v19, 2  ;;  %v1509_v14 = vrot.slane %v1508_v38, 2  ;;  %v1536_v35 = vmax.f32 %v1534_v42, %v1535_v12  ;;  %v3795_v40 = vmax.f32 %v3752_v61, %v3208_v58  ;;  %v3796_v12 = vld [vmem:[#allocation18_spill] sm:$0xff]  ;;  %v3797_v58 = vld [vmem:[#allocation47_spill] sm:$0xff] }
 0x19f   :  { %v2059_v52 = vpop.eup %2058  ;;  %v1891_v59 = vsel %vm1872_vm2, %v1890_v16, %v1889_v20  ;;  %2060 = vtanh.f32 %v1766_v31  ;;  %v1482_v3 = vmax.f32 %v1480_v49, %v1481_v25  ;;  %v1646_v9 = vmax.f32 %v1445_v10, %v1645_v6 }
 0x1a0   :  { %2062 = vtanh.f32 %v1780_v26  ;;  %v1906_v5 = vrot.slane %v2059_v52, 4  ;;  %v1720_v48 = vmax.f32 %v3795_v40, %v1620_v43  ;;  %v1612_v50 = vmax.f32 %v1610_v19, %v1611_v27  ;;  %v1323_v43 = vpop.f32.mrf.mxu0 }
 0x1a1   :  { %v1510_v53 = vmax.f32 %v1508_v38, %v1509_v14  ;;  %v1563_v63 = vrot.slane %v1562_v22, 2  ;;  %v1591_v7 = vrot.slane %v1436_v23, 4  ;;  %v1647_v54 = vrot.slane %v1646_v9, 2 }
 0x1a2   :  { %v1907_v33 = vsel %vm1875_vm3, %v1906_v5, %v1905_v4  ;;  %v1772_v20 = vadd.f32 %v3291_v62, %v1720_v48  ;;  %v1613_v47 = vrot.slane %v1612_v50, 1  ;;  %v1444_v42 = vadd.f32 %v3249_v0, %v1279_v41 }
 0x1a3   :  { %v1511_v26 = vrot.slane %v1510_v53, 1  ;;  %v3798_v61 = vmax.f32 %v3796_v12, %v3797_v58  ;;  %v1592_v49 = vmax.f32 %v1436_v23, %v1591_v7  ;;  %v1427_v10 = vadd.f32 %v3357_v24, %v1390_v45 }
 0x1a4   :  { %2064 = vtanh.f32 %v1772_v20  ;;  %v1614_v4 = vmax.f32 %v1612_v50, %v1613_v47  ;;  %v1648_v19 = vmax.f32 %v1646_v9, %v1647_v54  ;;  %v1639_v38 = vrot.slane %v1444_v42, 4  ;;  %v1358_v9 = vpop.f32.mrf.mxu1 }
 0x1a5   :  { %v3416_v16 = vmax.f32 %v3798_v61, %v1536_v35  ;;  %v2061_v25 = vpop.eup %2060  ;;  %v1512_v31 = vmax.f32 %v1510_v53, %v1511_v26  ;;  %v3799_v27 = vmax.f32 %v3769_v18, %v3266_v28  ;;  %v1564_v5 = vmax.f32 %v1562_v22, %v1563_v63  ;;  %v1393_v12 = vpop.f32.mrf.mxu2 }
 0x1a6   :  { %v3419_v6 = vpop.eup %2062  ;;  %v1892_v52 = vrot.slane %v2061_v25, 4  ;;  %v1537_v35 = vrot.slane %v1427_v10, 4  ;;  %v3800_v23 = vmax.f32 %v3768_v60, %v3261_v39  ;;  %v3801_v48 = vmax.f32 %v3770_v34, %v3269_v56  ;;  %v1282_v25 = vpop.f32.mrf.mxu3 }
 0x1a7   :  { %v1697_v14 = vmax.f32 %v3799_v27, %v1482_v3  ;;  %v1649_v50 = vrot.slane %v1648_v19, 1  ;;  %v1640_v53 = vmax.f32 %v1444_v42, %v1639_v38  ;;  %v1593_v20 = vrot.slane %v1592_v49, 2 }
 0x1a8   :  { %v1719_v40 = vmax.f32 %v3800_v23, %v1614_v4  ;;  %v1702_v41 = vmax.f32 %v3801_v48, %v1512_v31  ;;  %v1893_v45 = vsel %vm1875_vm3, %v1892_v52, %v1891_v59  ;;  %v1538_v7 = vmax.f32 %v1427_v10, %v1537_v35  ;;  %v3802_v59 = vld [vmem:[#allocation56_spill] sm:$0xff]  ;;  %v1343_v23 = vpop.f32.mrf.mxu0 }
 0x1a9   :  { %v1450_v28 = vadd.f32 %v3227_v2, %v1323_v43  ;;  %v1650_v3 = vmax.f32 %v1648_v19, %v1649_v50  ;;  %v1641_v39 = vrot.slane %v1640_v53, 2  ;;  %v1749_v63 = vadd.f32 %v3397_v13, %v1697_v14 }
 0x1aa   :  { %v1771_v18 = vadd.f32 %v3306_v51, %v1719_v40  ;;  %v1754_v22 = vadd.f32 %v3397_v13, %v1702_v41  ;;  %v2065_v60 = vpop.eup %2064  ;;  %v1539_v56 = vrot.slane %v1538_v7, 2  ;;  %v1441_v47 = vadd.f32 %v3338_v44, %v1358_v9  ;;  %v3804_v9 = vld [vmem:[#allocation16_spill] sm:$0xff] }
 0x1ab   :  { %v1675_v34 = vrot.slane %v1450_v28, 4  ;;  %v1908_v26 = vrot.slane %v2065_v60, 3  ;;  %v3803_v54 = vmax.f32 %v3757_v30, %v3802_v59  ;;  %v1642_v2 = vmax.f32 %v1640_v53, %v1641_v39  ;;  %v3807_v39 = vld [vmem:[#allocation36_spill] sm:$0xff]  ;;  %v3808_v60 = vld [vmem:[#allocation55_spill] sm:$0xff] }
 0x1ac   :  { %2066 = vtanh.f32 %v1771_v18  ;;  %v1565_v58 = vrot.slane %v1564_v5, 1  ;;  %v1540_v61 = vmax.f32 %v1538_v7, %v1539_v56  ;;  %v1594_v19 = vmax.f32 %v1592_v49, %v1593_v20  ;;  %v3805_v49 = vld [vmem:[#allocation48_spill] sm:$0xff] }
 0x1ad   :  { %v1725_v42 = vmax.f32 %v3803_v54, %v1650_v3  ;;  %2068 = vtanh.f32 %v1754_v22  ;;  %v1676_v10 = vmax.f32 %v1450_v28, %v1675_v34  ;;  %v1909_v4 = vsel %vm1878_vm4, %v1908_v26, %v1907_v33 }
 0x1ae   :  { %v1643_v38 = vrot.slane %v1642_v2, 1  ;;  %2070 = vtanh.f32 %v1749_v63  ;;  %v1541_v43 = vrot.slane %v1540_v61, 1  ;;  %v1621_v27 = vrot.slane %v1441_v47, 4 }
 0x1af   :  { %v1777_v31 = vadd.f32 %v3291_v62, %v1725_v42  ;;  %v1677_v52 = vrot.slane %v1676_v10, 2  ;;  %v1449_v14 = vadd.f32 %v3249_v0, %v1282_v25  ;;  %v1432_v35 = vadd.f32 %v3357_v24, %v1393_v12 }
 0x1b0   :  { %v1644_v30 = vmax.f32 %v1642_v2, %v1643_v38  ;;  %v1566_v40 = vmax.f32 %v1564_v5, %v1565_v58  ;;  %v1542_v48 = vmax.f32 %v1540_v61, %v1541_v43  ;;  %v1622_v50 = vmax.f32 %v1441_v47, %v1621_v27  ;;  %v1361_v61 = vpop.f32.mrf.mxu1  ;;  %v1396_v43 = vpop.f32.mrf.mxu2 }
 0x1b1   :  { %2072 = vtanh.f32 %v1777_v31  ;;  %v1678_v41 = vmax.f32 %v1676_v10, %v1677_v52  ;;  %v1595_v53 = vrot.slane %v1594_v19, 1  ;;  %v3806_v20 = vmax.f32 %v3804_v9, %v3805_v49  ;;  %v1402_v9 = vpop.f32.mrf.mxu3  ;;  %v3810_v49 = vld [vmem:[#allocation20_spill] sm:$0xff] }
 0x1b2   :  { %v2067_v33 = vpop.eup %2066  ;;  %v1669_v28 = vrot.slane %v1449_v14, 4  ;;  %v1567_v18 = vrot.slane %v1432_v35, 4  ;;  %v3809_v0 = vmax.f32 %v3807_v39, %v3808_v60  ;;  %v1416_v5 = vadd.f32 %v3338_v44, %v1343_v23 }
 0x1b3   :  { %v1724_v7 = vmax.f32 %v3806_v20, %v1644_v30  ;;  %v2069_v22 = vpop.eup %2068  ;;  %v1894_v3 = vrot.slane %v2067_v33, 3  ;;  %v1679_v56 = vrot.slane %v1678_v41, 1  ;;  %v1623_v26 = vrot.slane %v1622_v50, 2 }
 0x1b4   :  { %v1707_v63 = vmax.f32 %v3809_v0, %v1542_v48  ;;  %v1928_v34 = vrot.slane %v2069_v22, 7  ;;  %v1670_v59 = vmax.f32 %v1449_v14, %v1669_v28  ;;  %v2071_v54 = vpop.eup %2070  ;;  %v1568_v58 = vmax.f32 %v1432_v35, %v1567_v18 }
 0x1b5   :  { %v1776_v47 = vadd.f32 %v3306_v51, %v1724_v7  ;;  %v1895_v42 = vsel %vm1878_vm4, %v1894_v3, %v1893_v45  ;;  %v1680_v12 = vmax.f32 %v1678_v41, %v1679_v56  ;;  %v1624_v31 = vmax.f32 %v1622_v50, %v1623_v26 }
 0x1b6   :  { %v1759_v2 = vadd.f32 %v3397_v13, %v1707_v63  ;;  %v1929_v25 = vsel %vm1866_vm0, %v1928_v34, %v2071_v54  ;;  %v1671_v38 = vrot.slane %v1670_v59, 2  ;;  %v1569_v30 = vrot.slane %v1568_v58, 2  ;;  %v3814_v54 = vld [vmem:[#allocation50_spill] sm:$0xff] }
 0x1b7   :  { %v2073_v10 = vpop.eup %2072  ;;  %2074 = vtanh.f32 %v1776_v47  ;;  %v1730_v27 = vmax.f32 %v1192_v46, %v1680_v12  ;;  %v1625_v45 = vrot.slane %v1624_v31, 1  ;;  %v1471_v23 = vrot.slane %v1416_v5, 4  ;;  %v3816_v12 = vld [vmem:[#allocation19_spill] sm:$0xff] }
 0x1b8   :  { %v1910_v52 = vrot.slane %v2073_v10, 2  ;;  %2076 = vtanh.f32 %v1759_v2  ;;  %v1672_v14 = vmax.f32 %v1670_v59, %v1671_v38  ;;  %v1446_v35 = vadd.f32 %v3338_v44, %v1361_v61 }
 0x1b9   :  { %v3460_v48 = vadd.f32 %v3394_v29, %v3416_v16  ;;  %v1570_v50 = vmax.f32 %v1568_v58, %v1569_v30  ;;  %v1437_v33 = vadd.f32 %v3357_v24, %v1396_v43  ;;  %v3812_v57 = vmax.f32 %v3810_v49, %v3811_v15  ;;  %v3817_v58 = vld [vmem:[#allocation57_spill] sm:$0xff]  ;;  %v1346_v43 = vpop.f32.mrf.mxu0  ;;  %v1364_v49 = vpop.f32.mrf.mxu1 }
 0x1ba   :  { %v3463_v41 = vsel %vm1881_vm5, %v1910_v52, %v1909_v4  ;;  %v1782_v20 = vadd.f32 %v3291_v62, %v1730_v27  ;;  %v1673_v7 = vrot.slane %v1672_v14, 1  ;;  %v1472_v28 = vmax.f32 %v1416_v5, %v1471_v23  ;;  %v3813_v62 = vld [vmem:[#allocation38_spill] sm:$0xff]  ;;  %v3819_v52 = vld [vmem:[#allocation23_spill] sm:$0xff]  ;;  %v1399_v15 = vpop.f32.mrf.mxu2 }
 0x1bb   :  { %v1711_v46 = vmax.f32 %v3812_v57, %v1566_v40  ;;  %v1596_v18 = vmax.f32 %v1594_v19, %v1595_v53  ;;  %v1571_v22 = vrot.slane %v1570_v50, 1  ;;  %v1651_v3 = vrot.slane %v1446_v35, 4  ;;  %v3820_v27 = vld [vmem:[#allocation26_spill] sm:$0xff] }
 0x1bc   :  { %v1597_v16 = vrot.slane %v1437_v33, 4  ;;  %v1626_v60 = vmax.f32 %v1624_v31, %v1625_v45  ;;  %v1674_v4 = vmax.f32 %v1672_v14, %v1673_v7  ;;  %v1473_v0 = vrot.slane %v1472_v28, 2  ;;  %v3823_v7 = vld [vmem:[#allocation54_spill] sm:$0xff] }
 0x1bd   :  { %v2075_v39 = vpop.eup %2074  ;;  %v1447_v63 = vadd.f32 %v3357_v24, %v1402_v9  ;;  %v1572_v47 = vmax.f32 %v1570_v50, %v1571_v22  ;;  %v1652_v26 = vmax.f32 %v1446_v35, %v1651_v3  ;;  %2078 = vtanh.f32 %v1782_v20  ;;  %v3822_v20 = vld [vmem:[#allocation39_spill] sm:$0xff] }
 0x1be   :  { %v2077_v56 = vpop.eup %2076  ;;  %v1896_v34 = vrot.slane %v2075_v39, 2  ;;  %v1598_v59 = vmax.f32 %v1437_v33, %v1597_v16  ;;  %v3815_v5 = vmax.f32 %v3813_v62, %v3814_v54  ;;  %v1474_v53 = vmax.f32 %v1472_v28, %v1473_v0 }
 0x1bf   :  { %v1930_v40 = vrot.slane %v2077_v56, 6  ;;  %v3818_v61 = vmax.f32 %v3816_v12, %v3817_v58  ;;  %v1653_v31 = vrot.slane %v1652_v26, 2  ;;  %v3821_v30 = vmax.f32 %v3819_v52, %v3820_v27  ;;  %v3828_v27 = vld [vmem:[#allocation28_spill] sm:$0xff] }
 0x1c0   :  { %v1729_v19 = vmax.f32 %v3815_v5, %v1674_v4  ;;  %v3475_v2 = vsel %vm1881_vm5, %v1896_v34, %v1895_v42  ;;  %v1599_v38 = vrot.slane %v1598_v59, 2  ;;  %v1475_v35 = vrot.slane %v1474_v53, 1  ;;  %v3825_v5 = vld [vmem:[#allocation22_spill] sm:$0xff] }
 0x1c1   :  { %v1712_v10 = vmax.f32 %v3818_v61, %v1572_v47  ;;  %v1716_v45 = vmax.f32 %v3821_v30, %v1596_v18  ;;  %v1931_v14 = vsel %vm1869_vm1, %v1930_v40, %v1929_v25  ;;  %v1654_v42 = vmax.f32 %v1652_v26, %v1653_v31  ;;  %v3829_v30 = vld [vmem:[#allocation44_spill] sm:$0xff] }
 0x1c2   :  { %v1781_v23 = vadd.f32 %v3306_v51, %v1729_v19  ;;  %v1600_v33 = vmax.f32 %v1598_v59, %v1599_v38  ;;  %v1657_v9 = vrot.slane %v1447_v63, 4  ;;  %v1883_v57 = vrot.slane %v3419_v6, 1  ;;  %v1405_v6 = vpop.f32.mrf.mxu3  ;;  %v3826_v19 = vld [vmem:[#allocation25_spill] sm:$0xff] }
 0x1c3   :  { %v1764_v50 = vadd.f32 %v3397_v13, %v1712_v10  ;;  %v3824_v28 = vmax.f32 %v3822_v20, %v3823_v7  ;;  %v1421_v18 = vadd.f32 %v3338_v44, %v1346_v43  ;;  %v1655_v25 = vrot.slane %v1654_v42, 1  ;;  %v2079_v16 = vpop.eup %2078 }
 0x1c4   :  { %2080 = vtanh.f32 %v1781_v23  ;;  %v1601_v51 = vrot.slane %v1600_v33, 1  ;;  %v1658_v3 = vmax.f32 %v1447_v63, %v1657_v9  ;;  %v1763_v39 = vadd.f32 %v3394_v29, %v1711_v46 }
 0x1c5   :  { %v1721_v22 = vmax.f32 %v3824_v28, %v1626_v60  ;;  %2082 = vtanh.f32 %v1764_v50  ;;  %v1501_v4 = vrot.slane %v1421_v18, 4  ;;  %v1451_v0 = vadd.f32 %v3338_v44, %v1364_v49 }
 0x1c6   :  { %v1442_v56 = vadd.f32 %v3357_v24, %v1399_v15  ;;  %v1768_v34 = vadd.f32 %v3394_v29, %v1716_v45  ;;  %v1476_v47 = vmax.f32 %v1474_v53, %v1475_v35  ;;  %v1602_v60 = vmax.f32 %v1600_v33, %v1601_v51  ;;  %v3831_v15 = vld [vmem:[#allocation42_spill] sm:$0xff] }
 0x1c7   :  { %v1659_v26 = vrot.slane %v1658_v3, 2  ;;  %v1773_v59 = vadd.f32 %v3394_v29, %v1721_v22  ;;  %v1502_v40 = vmax.f32 %v1421_v18, %v1501_v4  ;;  %v1681_v62 = vrot.slane %v1451_v0, 4 }
 0x1c8   :  { %v1627_v54 = vrot.slane %v1442_v56, 4  ;;  %v1656_v63 = vmax.f32 %v1654_v42, %v1655_v25  ;;  %v3827_v46 = vmax.f32 %v3825_v5, %v3826_v19  ;;  %v1452_v44 = vadd.f32 %v3357_v24, %v1405_v6  ;;  %v3832_v24 = vld [vmem:[#allocation15_spill] sm:$0xff]  ;;  %v3837_v19 = vld [vmem:[#allocation52_spill] sm:$0xff] }
 0x1c9   :  { %v1660_v58 = vmax.f32 %v1658_v3, %v1659_v26  ;;  %v1912_v10 = vrot.slane %v2079_v16, 1  ;;  %v1503_v31 = vrot.slane %v1502_v40, 2  ;;  %v1682_v38 = vmax.f32 %v1451_v0, %v1681_v62 }
 0x1ca   :  { %v1717_v12 = vmax.f32 %v3827_v46, %v1602_v60  ;;  %v2081_v61 = vpop.eup %2080  ;;  %v1628_v53 = vmax.f32 %v1442_v56, %v1627_v54  ;;  %v3830_v45 = vmax.f32 %v3828_v27, %v3829_v30  ;;  %v3833_v20 = vmax.f32 %v3831_v15, %v3832_v24 }
 0x1cb   :  { %v2083_v43 = vpop.eup %2082  ;;  %v1898_v52 = vrot.slane %v2081_v61, 1  ;;  %v1661_v50 = vrot.slane %v1660_v58, 1  ;;  %v1504_v33 = vmax.f32 %v1502_v40, %v1503_v31  ;;  %v1683_v9 = vrot.slane %v1682_v38, 2 }
 0x1cc   :  { %v1696_v23 = vmax.f32 %v3830_v45, %v1476_v47  ;;  %v1769_v35 = vadd.f32 %v3397_v13, %v1717_v12  ;;  %v1932_v42 = vrot.slane %v2083_v43, 5  ;;  %v1629_v49 = vrot.slane %v1628_v53, 2 }
 0x1cd   :  { %v1726_v7 = vmax.f32 %v3833_v20, %v1656_v63  ;;  %v1662_v28 = vmax.f32 %v1660_v58, %v1661_v50  ;;  %v1687_v22 = vrot.slane %v1452_v44, 4  ;;  %v1505_v25 = vrot.slane %v1504_v33, 1  ;;  %v3840_v58 = vld [vmem:[#allocation43_spill] sm:$0xff] }
 0x1ce   :  { %v1933_v18 = vsel %vm1872_vm2, %v1932_v42, %v1931_v14  ;;  %2084 = vtanh.f32 %v1769_v35  ;;  %v1684_v51 = vmax.f32 %v1682_v38, %v1683_v9  ;;  %v1630_v16 = vmax.f32 %v1628_v53, %v1629_v49 }
 0x1cf   :  { %v1727_v3 = vmax.f32 %v1189_v8, %v1662_v28  ;;  %v1688_v4 = vmax.f32 %v1452_v44, %v1687_v22  ;;  %v1885_v0 = vsel %vm1884_vm6, %v1883_v57, %v3370_v36  ;;  %v1506_v56 = vmax.f32 %v1504_v33, %v1505_v25  ;;  %v3834_v8 = vld [vmem:[#allocation35_spill] sm:$0xff]  ;;  %v3835_v57 = vld [vmem:[#allocation45_spill] sm:$0xff] }
 0x1d0   :  { %v1685_v6 = vrot.slane %v1684_v51, 1  ;;  %v1899_v47 = vsel %vm1884_vm6, %v1898_v52, %v3475_v2  ;;  %v1913_v14 = vsel %vm1884_vm6, %v1912_v10, %v3463_v41  ;;  %1947 = vst [vmem:[#allocation10] sm:$0xff] %v1885_v0  ;;  %2086 = vtanh.f32 %v3460_v48 }
 0x1d1   :  { %v1748_v60 = vadd.f32 %v3394_v29, %v1696_v23  ;;  %v1631_v11 = vrot.slane %v1630_v16, 1  ;;  %v1689_v1 = vrot.slane %v1688_v4, 2  ;;  %1948 = vst [vmem:[#allocation10 + $0x8] sm:$0xff] %v1899_v47  ;;  %v1154_v36 = vmax.f32 %v3377_v32, %v1153_v37  ;;  %v3838_v32 = vld [vmem:[#allocation17_spill] sm:$0xff] }
 0x1d2   :  { %2088 = vtanh.f32 %v1763_v39  ;;  %v3836_v26 = vmax.f32 %v3834_v8, %v3835_v57  ;;  %v1686_v40 = vmax.f32 %v1684_v51, %v1685_v6  ;;  %1949 = vst [vmem:[#allocation10 + $0x10] sm:$0xff] %v1913_v14  ;;  %v1778_v41 = vadd.f32 %v3394_v29, %v1726_v7 }
 0x1d3   :  { %2090 = vtanh.f32 %v1768_v34  ;;  %v1632_v48 = vmax.f32 %v1630_v16, %v1631_v11  ;;  %v1690_v62 = vmax.f32 %v1688_v4, %v1689_v1  ;;  %v1779_v63 = vadd.f32 %v3397_v13, %v1727_v3 }
 0x1d4   :  { %v1701_v2 = vmax.f32 %v3836_v26, %v1506_v56  ;;  %v2085_v54 = vpop.eup %2084  ;;  %2092 = vtanh.f32 %v1773_v59  ;;  %v3839_v37 = vmax.f32 %v3837_v19, %v3838_v32  ;;  %v1194_v44 = vmax.f32 %v3840_v58, %v1154_v36 }
 0x1d5   :  { %2094 = vtanh.f32 %v1748_v60  ;;  %v1934_v46 = vrot.slane %v2085_v54, 4  ;;  %v1722_v34 = vmax.f32 %v1184_v17, %v1632_v48  ;;  %v1691_v12 = vrot.slane %v1690_v62, 1 }
 0x1d6   :  { %v1753_v5 = vadd.f32 %v3394_v29, %v1701_v2  ;;  %v1731_v39 = vmax.f32 %v3839_v37, %v1686_v40  ;;  %v2087_v61 = vpop.eup %2086 }
 0x1d7   :  { %v1935_v10 = vsel %vm1875_vm3, %v1934_v46, %v1933_v18  ;;  %v1774_v31 = vadd.f32 %v3397_v13, %v1722_v34  ;;  %v1692_v38 = vmax.f32 %v1690_v62, %v1691_v12  ;;  %v1916_v23 = vrot.slane %v2087_v61, 6 }
 0x1d8   :  { %2096 = vtanh.f32 %v1753_v5  ;;  %v1783_v59 = vadd.f32 %v3394_v29, %v1731_v39  ;;  %v2089_v53 = vpop.eup %2088 }
 0x1d9   :  { %2098 = vtanh.f32 %v1778_v41  ;;  %v2091_v43 = vpop.eup %2090  ;;  %v1732_v52 = vmax.f32 %v1194_v44, %v1692_v38  ;;  %v1918_v50 = vrot.slane %v2089_v53, 5 }
 0x1da   :  { %2100 = vtanh.f32 %v1779_v63  ;;  %v2093_v55 = vpop.eup %2092  ;;  %v1920_v9 = vrot.slane %v2091_v43, 4 }
 0x1db   :  { %2102 = vtanh.f32 %v1774_v31  ;;  %v2095_v21 = vpop.eup %2094  ;;  %v1784_v17 = vadd.f32 %v3397_v13, %v1732_v52  ;;  %v1922_v24 = vrot.slane %v2093_v55, 3 }
 0x1dc   :  { %2104 = vtanh.f32 %v1783_v59 }
 0x1dd   :  { %2106 = vtanh.f32 %v1784_v17 }
 0x1de   :  { %v2097_v27 = vpop.eup %2096 }
 0x1df   :  { %v2099_v30 = vpop.eup %2098  ;;  %v1914_v29 = vrot.slane %v2097_v27, 7 }
 0x1e0   :  { %v2101_v45 = vpop.eup %2100  ;;  %v1924_v13 = vrot.slane %v2099_v30, 2 }
 0x1e1   :  { %v2103_v35 = vpop.eup %2102  ;;  %v1915_v42 = vsel %vm1866_vm0, %v1914_v29, %v2095_v21  ;;  %v1938_v20 = vrot.slane %v2101_v45, 2 }
 0x1e2   :  { %v2105_v33 = vpop.eup %2104  ;;  %v1917_v49 = vsel %vm1869_vm1, %v1916_v23, %v1915_v42  ;;  %v1936_v15 = vrot.slane %v2103_v35, 3 }
 0x1e3   :  { %v1919_v7 = vsel %vm1872_vm2, %v1918_v50, %v1917_v49  ;;  %v2107_v18 = vpop.eup %2106  ;;  %v1926_v25 = vrot.slane %v2105_v33, 1 }
 0x1e4   :  { %v1937_v28 = vsel %vm1878_vm4, %v1936_v15, %v1935_v10  ;;  %v1921_v22 = vsel %vm1875_vm3, %v1920_v9, %v1919_v7  ;;  %v1940_v16 = vrot.slane %v2107_v18, 1 }
 0x1e5   :  { %v1923_v51 = vsel %vm1878_vm4, %v1922_v24, %v1921_v22  ;;  %v1939_v3 = vsel %vm1881_vm5, %v1938_v20, %v1937_v28 }
 0x1e6   :  { %v1925_v4 = vsel %vm1881_vm5, %v1924_v13, %v1923_v51  ;;  %v1941_v56 = vsel %vm1884_vm6, %v1940_v16, %v1939_v3 }
 0x1e7   :  { %v1927_v0 = vsel %vm1884_vm6, %v1926_v25, %v1925_v4  ;;  %1951 = vst [vmem:[#allocation10 + $0x20] sm:$0xff] %v1941_v56 }
 0x1e8   :  { %1950 = vst [vmem:[#allocation10 + $0x18] sm:$0xff] %v1927_v0 }
 0x1e9   :  { %1962 = dma.vmem_to_hbm [thread:$0]  %s1958_s3, 640, %s1960_s13, [#allocation4]  }
 0x1ea   :  { %2234 = dma.done.wait [#allocation4], 640  }
 0x1eb   :  { %2235 = vsyncadd [#allocation4], 4294966656 }
 0x1ec   :  { %1967 = vsyncpa [#allocation3], 1 }
 0x1ed   :  { %1968 = vsyncpa [#allocation6], 1 }
 0x1ee   :  { %1969 = vsyncpa [#allocation9], 1 }
 0x1ef   :  { %1970 = vsyncpa [#allocation4], 1 }

</bundles_post_ra>
